<compile_context>
chip_gen: v7x
topology: tpu7x:2x2x1
jax: 0.10.0
libtpu: 0.0.40
codegen_flags: <defaults>
</compile_context>

<pallas_src>
import functools

import numpy as np
import jax
import jax.numpy as jnp
from jax.experimental import pallas as pl
from jax.experimental.pallas import tpu as pltpu


def _flow_reg_kernel(data_ref, gnorm_ref, out_ref, fl_scr, arg_scr, *,
                     offsets, taps_sq, W, N, B, C, pad, lambda_color):
    """Single-step kernel; batch folded onto the sublane axis.

    data_ref : (2 + 2B + CB, N) rows = [h coord, w coord,
                                        flow ch0 (B rows), flow ch1 (B rows),
                                        img ch0 (B rows), ..., img ch{C-1} (B rows)]
               (channel-major so channel sums are contiguous row-block adds)
    gnorm_ref: (1, N)   ||spatial_grid(p)||^2   (batch & tap invariant)
    out_ref  : (1, 128) lane-padded un-scaled sum over all taps/batches/pixels
    fl_scr   : (n_taps*B, N) scratch rows of per-tap/per-batch flow_loss
    arg_scr  : (n_taps*B, N) scratch rows of per-tap/per-batch exp arguments
    """
    data = data_ref[...]                      # (2 + 2B + CB, N)
    hc = data[0:1, :]                         # (1, N) row coordinate
    wc = data[1:2, :]                         # (1, N) col coordinate
    vals = data[2:, :]                        # (2B + CB, N) flow + image rows
    gnorm = gnorm_ref[...]                    # (1, N)

    lam = jnp.float32(lambda_color)
    thresh = pad + 0.5
    nf = 2 * B                                # number of flow rows

    for t, ((dh, dw), sq) in enumerate(zip(offsets, taps_sq)):
        shift = (-(dh * W + dw)) % N
        rolled = pltpu.roll(data, shift, axis=1)          # one XLU roll / tap
        rh = rolled[0:1, :]
        rw = rolled[1:2, :]

        # Zero-padding mask from the rolled coordinate rows of the SAME
        # rotation: exact and independent of the rotate-direction convention.
        inb = ((jnp.abs(rh - hc) < thresh) &
               (jnp.abs(rw - wc) < thresh))                # (1, N) bool
        m = jnp.where(inb, 1.0, 0.0)                       # (1, N) f32 mask

        nb = rolled[2:, :] * m                             # masked neighbours
        d = nb - vals                                      # (2B + CB, N)
        d2 = d * d

        # Spatial weight: per-tap constant for in-bounds pixels (uniform grid,
        # symmetric under o -> -o), ||g(p)||^2 for zero-padded neighbours.
        sp_w = jnp.where(inb, jnp.float32(sq), gnorm)      # (1, N)

        # Unrolled channel sums (VALU), contiguous row blocks per channel.
        fl = d2[0:B, :] + d2[B:nf, :]                      # (B, N) flow loss
        iw = d2[nf:nf + B, :]                              # (B, N) image wgt
        for c in range(1, C):
            iw = iw + d2[nf + c * B:nf + (c + 1) * B, :]
        arg = iw * lam + sp_w                              # (B, N)

        fl_scr[t * B:(t + 1) * B, :] = fl
        arg_scr[t * B:(t + 1) * B, :] = arg

    # One dense EUP exp + multiply + reduction over every (tap, batch) row.
    w = jnp.exp(-arg_scr[...])                             # (n_taps*B, N)
    prod = fl_scr[...] * w
    col = jnp.sum(prod, axis=0, keepdims=True)             # (1, N)  sublane
    tot = jnp.sum(col, axis=1, keepdims=True)              # (1, 1)  lane
    out_ref[...] = jnp.broadcast_to(tot, (1, 128))


def flow_reg_loss(flow, image, spatial_grid, *, patch_size, img_size,
                  lambda_color):
    """Pallas implementation of FlowRegLoss.forward."""
    pad = (patch_size - 1) // 2
    B, c_flow, H, W = flow.shape
    assert c_flow == 2
    C = image.shape[1]
    N = H * W
    # The roll + mask trick requires that any wrapped neighbour fails the
    # |delta| < pad + 0.5 test.
    assert 2 * pad < W and 2 * pad < H, "patch_size too large for image"

    # Channel-major, batch-on-sublane, lane-dense flattening.
    flow_cm = jnp.transpose(flow.astype(jnp.float32).reshape(B, 2, N),
                            (1, 0, 2)).reshape(2 * B, N)
    img_cm = jnp.transpose(image.astype(jnp.float32).reshape(B, C, N),
                           (1, 0, 2)).reshape(C * B, N)

    hh, ww = np.meshgrid(np.arange(H, dtype=np.float32),
                         np.arange(W, dtype=np.float32), indexing="ij")
    coords = jnp.asarray(np.stack([hh.reshape(-1), ww.reshape(-1)], axis=0))

    data = jnp.concatenate([coords, flow_cm, img_cm], axis=0)  # (2+2B+CB, N)

    g = spatial_grid.astype(jnp.float32).reshape(2, N)
    gnorm = jnp.sum(g * g, axis=0, keepdims=True)              # (1, N)

    offsets = tuple((dh, dw)
                    for dh in range(-pad, pad + 1)
                    for dw in range(-pad, pad + 1)
                    if not (dh == 0 and dw == 0))              # center skipped
    delta = 2.0 / (img_size - 1)                               # grid spacing
    taps_sq = tuple(float((dh * dh + dw * dw) * delta * delta)
                    for dh, dw in offsets)

    n_rows = len(offsets) * B
    R = 2 + 2 * B + C * B

    kernel = functools.partial(
        _flow_reg_kernel, offsets=offsets, taps_sq=taps_sq, W=W, N=N,
        B=B, C=C, pad=pad, lambda_color=float(lambda_color))

    out = pl.pallas_call(
        kernel,
        out_shape=jax.ShapeDtypeStruct((1, 128), jnp.float32),
        grid_spec=pltpu.PrefetchScalarGridSpec(
            num_scalar_prefetch=0,
            grid=(1,),
            in_specs=[
                pl.BlockSpec((R, N), lambda i: (0, 0)),
                pl.BlockSpec((1, N), lambda i: (0, 0)),
            ],
            out_specs=pl.BlockSpec((1, 128), lambda i: (0, 0)),
            scratch_shapes=[pltpu.VMEM((n_rows, N), jnp.float32),
                            pltpu.VMEM((n_rows, N), jnp.float32)],
        ),
        compiler_params=pltpu.CompilerParams(
            dimension_semantics=("arbitrary",)),
    )(data, gnorm)

    # `flow *= img_size` in the reference scales flow_loss by img_size**2
    # (zero padding commutes with the scale); the mean denominator counts the
    # skipped centre tap as well.
    n_terms = B * patch_size * patch_size * N
    scale = (float(img_size) ** 2) / float(n_terms)
    return out[0, 0] * scale


def flow_reg_loss_ref(flow, image, grid, *, patch_size, img_size,
                      lambda_color):
    """Pure-JAX reference mirroring the PyTorch forward."""
    pad = (patch_size - 1) // 2
    flow = flow * img_size
    fp = jnp.pad(flow, ((0, 0), (0, 0), (pad, pad), (pad, pad)))
    ip = jnp.pad(image, ((0, 0), (0, 0), (pad, pad), (pad, pad)))
    gp = jnp.pad(grid, ((0, 0), (pad, pad), (pad, pad)))
    _, _, H, W = flow.shape
    losses = []
    for kh in range(patch_size):
        for kw in range(patch_size):
            fn = fp[:, :, kh:kh + H, kw:kw + W]
            imn = ip[:, :, kh:kh + H, kw:kw + W]
            gn = gp[:, kh:kh + H, kw:kw + W]
            fl = jnp.sum((fn - flow) ** 2, axis=1)
            iw = jnp.sum((image - imn) ** 2, axis=1)
            sw = jnp.sum((grid - gn) ** 2, axis=0)
            losses.append(fl * jnp.exp(-(iw * lambda_color + sw)))
    return jnp.mean(jnp.stack(losses, axis=1))


def make_spatial_grid(img_size):
    # np.mgrid[-1:1+eps:2/(img_size-1), ...] -> (2, img_size, img_size)
    coords = np.linspace(-1.0, 1.0, img_size, dtype=np.float32)
    gy, gx = np.meshgrid(coords, coords, indexing="ij")
    return jnp.asarray(np.stack([gy, gx], axis=0), dtype=jnp.float32)


if __name__ == "__main__":
    # opt: patch_size=3, img_size=16, lambda_color=10.0
    patch_size = 3
    img_size = 16
    lambda_color = 10.0

    B, C_flow, C_img = 2, 2, 3
    key = jax.random.PRNGKey(0)
    k1, k2 = jax.random.split(key)
    flow = jax.random.normal(k1, (B, C_flow, img_size, img_size),
                             dtype=jnp.float32) * 0.05
    image = jax.random.uniform(k2, (B, C_img, img_size, img_size),
                               dtype=jnp.float32)
    spatial_grid = make_spatial_grid(img_size)

    loss = flow_reg_loss(flow, image, spatial_grid, patch_size=patch_size,
                         img_size=img_size, lambda_color=lambda_color)
    loss = jax.block_until_ready(loss)

    loss_ref = flow_reg_loss_ref(flow, image, spatial_grid,
                                 patch_size=patch_size, img_size=img_size,
                                 lambda_color=lambda_color)
    loss_ref = jax.block_until_ready(loss_ref)

    np.testing.assert_allclose(np.asarray(loss), np.asarray(loss_ref),
                               rtol=1e-4, atol=1e-5)
    print("KERNEL_OK")
</pallas_src>

<mosaic_0001>
module attributes {stable_mosaic.version = 11 : i64} {
  func.func @_flow_reg_kernel(%arg0: i32, %arg1: memref<12x256xf32, #tpu.memory_space<vmem>>, %arg2: memref<1x256xf32, #tpu.memory_space<vmem>>, %arg3: memref<1x128xf32, #tpu.memory_space<vmem>>, %arg4: memref<16x256xf32, #tpu.memory_space<vmem>>, %arg5: memref<16x256xf32, #tpu.memory_space<vmem>>) attributes {dimension_semantics = [#tpu.dimension_semantics<arbitrary>], iteration_bounds = array<i64: 1>, scalar_prefetch = 0 : i64, scratch_operands = 2 : i64, tpu.core_type = #tpu.core_type<tc>, window_params = [{pipeline_mode = #tpu.pipeline_mode<synchronous>, transform_indices = @transform_0, window_bounds = array<i64: 12, 256>}, {pipeline_mode = #tpu.pipeline_mode<synchronous>, transform_indices = @transform_1, window_bounds = array<i64: 1, 256>}, {pipeline_mode = #tpu.pipeline_mode<synchronous>, transform_indices = @transform_2, window_bounds = array<i64: 1, 128>}]} {
    %c0 = arith.constant 0 : index
    %c0_0 = arith.constant 0 : index
    %0 = vector.load %arg1[%c0, %c0_0] : memref<12x256xf32, #tpu.memory_space<vmem>>, vector<12x256xf32>
    %1 = vector.extract_strided_slice %0 {offsets = [0, 0], sizes = [1, 256], strides = [1, 1]} : vector<12x256xf32> to vector<1x256xf32>
    %2 = vector.extract_strided_slice %0 {offsets = [1, 0], sizes = [1, 256], strides = [1, 1]} : vector<12x256xf32> to vector<1x256xf32>
    %3 = vector.extract_strided_slice %0 {offsets = [2, 0], sizes = [10, 256], strides = [1, 1]} : vector<12x256xf32> to vector<10x256xf32>
    %c0_1 = arith.constant 0 : index
    %c0_2 = arith.constant 0 : index
    %4 = vector.load %arg2[%c0_1, %c0_2] : memref<1x256xf32, #tpu.memory_space<vmem>>, vector<1x256xf32>
    %c17_i32 = arith.constant 17 : i32
    %5 = tpu.dynamic_rotate %0 by %c17_i32 dim 1 : vector<12x256xf32>, i32 -> vector<12x256xf32>
    %6 = vector.extract_strided_slice %5 {offsets = [0, 0], sizes = [1, 256], strides = [1, 1]} : vector<12x256xf32> to vector<1x256xf32>
    %7 = vector.extract_strided_slice %5 {offsets = [1, 0], sizes = [1, 256], strides = [1, 1]} : vector<12x256xf32> to vector<1x256xf32>
    %8 = arith.subf %6, %1 : vector<1x256xf32>
    %9 = math.absf %8 : vector<1x256xf32>
    %cst = arith.constant 1.500000e+00 : f32
    %10 = vector.broadcast %cst : f32 to vector<1x256xf32>
    %11 = arith.cmpf olt, %9, %10 : vector<1x256xf32>
    %12 = arith.subf %7, %2 : vector<1x256xf32>
    %13 = math.absf %12 : vector<1x256xf32>
    %cst_3 = arith.constant 1.500000e+00 : f32
    %14 = vector.broadcast %cst_3 : f32 to vector<1x256xf32>
    %15 = arith.cmpf olt, %13, %14 : vector<1x256xf32>
    %16 = arith.andi %11, %15 : vector<1x256xi1>
    %cst_4 = arith.constant 1.000000e+00 : f32
    %cst_5 = arith.constant 0.000000e+00 : f32
    %17 = vector.broadcast %cst_4 : f32 to vector<1x256xf32>
    %18 = vector.broadcast %cst_5 : f32 to vector<1x256xf32>
    %19 = arith.select %16, %17, %18 : vector<1x256xi1>, vector<1x256xf32>
    %20 = vector.extract_strided_slice %5 {offsets = [2, 0], sizes = [10, 256], strides = [1, 1]} : vector<12x256xf32> to vector<10x256xf32>
    %21 = vector.broadcast %19 : vector<1x256xf32> to vector<10x256xf32>
    %22 = arith.mulf %20, %21 : vector<10x256xf32>
    %23 = arith.subf %22, %3 : vector<10x256xf32>
    %24 = arith.mulf %23, %23 : vector<10x256xf32>
    %cst_6 = arith.constant 0.0355555564 : f32
    %25 = vector.broadcast %cst_6 : f32 to vector<1x256xf32>
    %26 = arith.select %16, %25, %4 : vector<1x256xi1>, vector<1x256xf32>
    %27 = vector.extract_strided_slice %24 {offsets = [0, 0], sizes = [2, 256], strides = [1, 1]} : vector<10x256xf32> to vector<2x256xf32>
    %28 = vector.extract_strided_slice %24 {offsets = [2, 0], sizes = [2, 256], strides = [1, 1]} : vector<10x256xf32> to vector<2x256xf32>
    %29 = arith.addf %27, %28 : vector<2x256xf32>
    %30 = vector.extract_strided_slice %24 {offsets = [4, 0], sizes = [2, 256], strides = [1, 1]} : vector<10x256xf32> to vector<2x256xf32>
    %31 = vector.extract_strided_slice %24 {offsets = [6, 0], sizes = [2, 256], strides = [1, 1]} : vector<10x256xf32> to vector<2x256xf32>
    %32 = arith.addf %30, %31 : vector<2x256xf32>
    %33 = vector.extract_strided_slice %24 {offsets = [8, 0], sizes = [2, 256], strides = [1, 1]} : vector<10x256xf32> to vector<2x256xf32>
    %34 = arith.addf %32, %33 : vector<2x256xf32>
    %cst_7 = arith.constant 1.000000e+01 : f32
    %35 = vector.broadcast %cst_7 : f32 to vector<2x256xf32>
    %36 = arith.mulf %34, %35 : vector<2x256xf32>
    %37 = vector.broadcast %26 : vector<1x256xf32> to vector<2x256xf32>
    %38 = arith.addf %36, %37 : vector<2x256xf32>
    %c0_8 = arith.constant 0 : index
    %c0_9 = arith.constant 0 : index
    %39 = vector.load %arg4[%c0_8, %c0_9] : memref<16x256xf32, #tpu.memory_space<vmem>>, vector<2x256xf32>
    tpu.vector_store %arg4[%c0_8, %c0_9], %29 {strides = array<i32>} : memref<16x256xf32, #tpu.memory_space<vmem>>, vector<2x256xf32>,
    %c0_10 = arith.constant 0 : index
    %c0_11 = arith.constant 0 : index
    %40 = vector.load %arg5[%c0_10, %c0_11] : memref<16x256xf32, #tpu.memory_space<vmem>>, vector<2x256xf32>
    tpu.vector_store %arg5[%c0_10, %c0_11], %38 {strides = array<i32>} : memref<16x256xf32, #tpu.memory_space<vmem>>, vector<2x256xf32>,
    %c16_i32 = arith.constant 16 : i32
    %41 = tpu.dynamic_rotate %0 by %c16_i32 dim 1 : vector<12x256xf32>, i32 -> vector<12x256xf32>
    %42 = vector.extract_strided_slice %41 {offsets = [0, 0], sizes = [1, 256], strides = [1, 1]} : vector<12x256xf32> to vector<1x256xf32>
    %43 = vector.extract_strided_slice %41 {offsets = [1, 0], sizes = [1, 256], strides = [1, 1]} : vector<12x256xf32> to vector<1x256xf32>
    %44 = arith.subf %42, %1 : vector<1x256xf32>
    %45 = math.absf %44 : vector<1x256xf32>
    %cst_12 = arith.constant 1.500000e+00 : f32
    %46 = vector.broadcast %cst_12 : f32 to vector<1x256xf32>
    %47 = arith.cmpf olt, %45, %46 : vector<1x256xf32>
    %48 = arith.subf %43, %2 : vector<1x256xf32>
    %49 = math.absf %48 : vector<1x256xf32>
    %cst_13 = arith.constant 1.500000e+00 : f32
    %50 = vector.broadcast %cst_13 : f32 to vector<1x256xf32>
    %51 = arith.cmpf olt, %49, %50 : vector<1x256xf32>
    %52 = arith.andi %47, %51 : vector<1x256xi1>
    %cst_14 = arith.constant 1.000000e+00 : f32
    %cst_15 = arith.constant 0.000000e+00 : f32
    %53 = vector.broadcast %cst_14 : f32 to vector<1x256xf32>
    %54 = vector.broadcast %cst_15 : f32 to vector<1x256xf32>
    %55 = arith.select %52, %53, %54 : vector<1x256xi1>, vector<1x256xf32>
    %56 = vector.extract_strided_slice %41 {offsets = [2, 0], sizes = [10, 256], strides = [1, 1]} : vector<12x256xf32> to vector<10x256xf32>
    %57 = vector.broadcast %55 : vector<1x256xf32> to vector<10x256xf32>
    %58 = arith.mulf %56, %57 : vector<10x256xf32>
    %59 = arith.subf %58, %3 : vector<10x256xf32>
    %60 = arith.mulf %59, %59 : vector<10x256xf32>
    %cst_16 = arith.constant 0.0177777782 : f32
    %61 = vector.broadcast %cst_16 : f32 to vector<1x256xf32>
    %62 = arith.select %52, %61, %4 : vector<1x256xi1>, vector<1x256xf32>
    %63 = vector.extract_strided_slice %60 {offsets = [0, 0], sizes = [2, 256], strides = [1, 1]} : vector<10x256xf32> to vector<2x256xf32>
    %64 = vector.extract_strided_slice %60 {offsets = [2, 0], sizes = [2, 256], strides = [1, 1]} : vector<10x256xf32> to vector<2x256xf32>
    %65 = arith.addf %63, %64 : vector<2x256xf32>
    %66 = vector.extract_strided_slice %60 {offsets = [4, 0], sizes = [2, 256], strides = [1, 1]} : vector<10x256xf32> to vector<2x256xf32>
    %67 = vector.extract_strided_slice %60 {offsets = [6, 0], sizes = [2, 256], strides = [1, 1]} : vector<10x256xf32> to vector<2x256xf32>
    %68 = arith.addf %66, %67 : vector<2x256xf32>
    %69 = vector.extract_strided_slice %60 {offsets = [8, 0], sizes = [2, 256], strides = [1, 1]} : vector<10x256xf32> to vector<2x256xf32>
    %70 = arith.addf %68, %69 : vector<2x256xf32>
    %cst_17 = arith.constant 1.000000e+01 : f32
    %71 = vector.broadcast %cst_17 : f32 to vector<2x256xf32>
    %72 = arith.mulf %70, %71 : vector<2x256xf32>
    %73 = vector.broadcast %62 : vector<1x256xf32> to vector<2x256xf32>
    %74 = arith.addf %72, %73 : vector<2x256xf32>
    %c2 = arith.constant 2 : index
    %c0_18 = arith.constant 0 : index
    %75 = vector.load %arg4[%c2, %c0_18] : memref<16x256xf32, #tpu.memory_space<vmem>>, vector<2x256xf32>
    tpu.vector_store %arg4[%c2, %c0_18], %65 {strides = array<i32>} : memref<16x256xf32, #tpu.memory_space<vmem>>, vector<2x256xf32>,
    %c2_19 = arith.constant 2 : index
    %c0_20 = arith.constant 0 : index
    %76 = vector.load %arg5[%c2_19, %c0_20] : memref<16x256xf32, #tpu.memory_space<vmem>>, vector<2x256xf32>
    tpu.vector_store %arg5[%c2_19, %c0_20], %74 {strides = array<i32>} : memref<16x256xf32, #tpu.memory_space<vmem>>, vector<2x256xf32>,
    %c15_i32 = arith.constant 15 : i32
    %77 = tpu.dynamic_rotate %0 by %c15_i32 dim 1 : vector<12x256xf32>, i32 -> vector<12x256xf32>
    %78 = vector.extract_strided_slice %77 {offsets = [0, 0], sizes = [1, 256], strides = [1, 1]} : vector<12x256xf32> to vector<1x256xf32>
    %79 = vector.extract_strided_slice %77 {offsets = [1, 0], sizes = [1, 256], strides = [1, 1]} : vector<12x256xf32> to vector<1x256xf32>
    %80 = arith.subf %78, %1 : vector<1x256xf32>
    %81 = math.absf %80 : vector<1x256xf32>
    %cst_21 = arith.constant 1.500000e+00 : f32
    %82 = vector.broadcast %cst_21 : f32 to vector<1x256xf32>
    %83 = arith.cmpf olt, %81, %82 : vector<1x256xf32>
    %84 = arith.subf %79, %2 : vector<1x256xf32>
    %85 = math.absf %84 : vector<1x256xf32>
    %cst_22 = arith.constant 1.500000e+00 : f32
    %86 = vector.broadcast %cst_22 : f32 to vector<1x256xf32>
    %87 = arith.cmpf olt, %85, %86 : vector<1x256xf32>
    %88 = arith.andi %83, %87 : vector<1x256xi1>
    %cst_23 = arith.constant 1.000000e+00 : f32
    %cst_24 = arith.constant 0.000000e+00 : f32
    %89 = vector.broadcast %cst_23 : f32 to vector<1x256xf32>
    %90 = vector.broadcast %cst_24 : f32 to vector<1x256xf32>
    %91 = arith.select %88, %89, %90 : vector<1x256xi1>, vector<1x256xf32>
    %92 = vector.extract_strided_slice %77 {offsets = [2, 0], sizes = [10, 256], strides = [1, 1]} : vector<12x256xf32> to vector<10x256xf32>
    %93 = vector.broadcast %91 : vector<1x256xf32> to vector<10x256xf32>
    %94 = arith.mulf %92, %93 : vector<10x256xf32>
    %95 = arith.subf %94, %3 : vector<10x256xf32>
    %96 = arith.mulf %95, %95 : vector<10x256xf32>
    %cst_25 = arith.constant 0.0355555564 : f32
    %97 = vector.broadcast %cst_25 : f32 to vector<1x256xf32>
    %98 = arith.select %88, %97, %4 : vector<1x256xi1>, vector<1x256xf32>
    %99 = vector.extract_strided_slice %96 {offsets = [0, 0], sizes = [2, 256], strides = [1, 1]} : vector<10x256xf32> to vector<2x256xf32>
    %100 = vector.extract_strided_slice %96 {offsets = [2, 0], sizes = [2, 256], strides = [1, 1]} : vector<10x256xf32> to vector<2x256xf32>
    %101 = arith.addf %99, %100 : vector<2x256xf32>
    %102 = vector.extract_strided_slice %96 {offsets = [4, 0], sizes = [2, 256], strides = [1, 1]} : vector<10x256xf32> to vector<2x256xf32>
    %103 = vector.extract_strided_slice %96 {offsets = [6, 0], sizes = [2, 256], strides = [1, 1]} : vector<10x256xf32> to vector<2x256xf32>
    %104 = arith.addf %102, %103 : vector<2x256xf32>
    %105 = vector.extract_strided_slice %96 {offsets = [8, 0], sizes = [2, 256], strides = [1, 1]} : vector<10x256xf32> to vector<2x256xf32>
    %106 = arith.addf %104, %105 : vector<2x256xf32>
    %cst_26 = arith.constant 1.000000e+01 : f32
    %107 = vector.broadcast %cst_26 : f32 to vector<2x256xf32>
    %108 = arith.mulf %106, %107 : vector<2x256xf32>
    %109 = vector.broadcast %98 : vector<1x256xf32> to vector<2x256xf32>
    %110 = arith.addf %108, %109 : vector<2x256xf32>
    %c4 = arith.constant 4 : index
    %c0_27 = arith.constant 0 : index
    %111 = vector.load %arg4[%c4, %c0_27] : memref<16x256xf32, #tpu.memory_space<vmem>>, vector<2x256xf32>
    tpu.vector_store %arg4[%c4, %c0_27], %101 {strides = array<i32>} : memref<16x256xf32, #tpu.memory_space<vmem>>, vector<2x256xf32>,
    %c4_28 = arith.constant 4 : index
    %c0_29 = arith.constant 0 : index
    %112 = vector.load %arg5[%c4_28, %c0_29] : memref<16x256xf32, #tpu.memory_space<vmem>>, vector<2x256xf32>
    tpu.vector_store %arg5[%c4_28, %c0_29], %110 {strides = array<i32>} : memref<16x256xf32, #tpu.memory_space<vmem>>, vector<2x256xf32>,
    %c1_i32 = arith.constant 1 : i32
    %113 = tpu.dynamic_rotate %0 by %c1_i32 dim 1 : vector<12x256xf32>, i32 -> vector<12x256xf32>
    %114 = vector.extract_strided_slice %113 {offsets = [0, 0], sizes = [1, 256], strides = [1, 1]} : vector<12x256xf32> to vector<1x256xf32>
    %115 = vector.extract_strided_slice %113 {offsets = [1, 0], sizes = [1, 256], strides = [1, 1]} : vector<12x256xf32> to vector<1x256xf32>
    %116 = arith.subf %114, %1 : vector<1x256xf32>
    %117 = math.absf %116 : vector<1x256xf32>
    %cst_30 = arith.constant 1.500000e+00 : f32
    %118 = vector.broadcast %cst_30 : f32 to vector<1x256xf32>
    %119 = arith.cmpf olt, %117, %118 : vector<1x256xf32>
    %120 = arith.subf %115, %2 : vector<1x256xf32>
    %121 = math.absf %120 : vector<1x256xf32>
    %cst_31 = arith.constant 1.500000e+00 : f32
    %122 = vector.broadcast %cst_31 : f32 to vector<1x256xf32>
    %123 = arith.cmpf olt, %121, %122 : vector<1x256xf32>
    %124 = arith.andi %119, %123 : vector<1x256xi1>
    %cst_32 = arith.constant 1.000000e+00 : f32
    %cst_33 = arith.constant 0.000000e+00 : f32
    %125 = vector.broadcast %cst_32 : f32 to vector<1x256xf32>
    %126 = vector.broadcast %cst_33 : f32 to vector<1x256xf32>
    %127 = arith.select %124, %125, %126 : vector<1x256xi1>, vector<1x256xf32>
    %128 = vector.extract_strided_slice %113 {offsets = [2, 0], sizes = [10, 256], strides = [1, 1]} : vector<12x256xf32> to vector<10x256xf32>
    %129 = vector.broadcast %127 : vector<1x256xf32> to vector<10x256xf32>
    %130 = arith.mulf %128, %129 : vector<10x256xf32>
    %131 = arith.subf %130, %3 : vector<10x256xf32>
    %132 = arith.mulf %131, %131 : vector<10x256xf32>
    %cst_34 = arith.constant 0.0177777782 : f32
    %133 = vector.broadcast %cst_34 : f32 to vector<1x256xf32>
    %134 = arith.select %124, %133, %4 : vector<1x256xi1>, vector<1x256xf32>
    %135 = vector.extract_strided_slice %132 {offsets = [0, 0], sizes = [2, 256], strides = [1, 1]} : vector<10x256xf32> to vector<2x256xf32>
    %136 = vector.extract_strided_slice %132 {offsets = [2, 0], sizes = [2, 256], strides = [1, 1]} : vector<10x256xf32> to vector<2x256xf32>
    %137 = arith.addf %135, %136 : vector<2x256xf32>
    %138 = vector.extract_strided_slice %132 {offsets = [4, 0], sizes = [2, 256], strides = [1, 1]} : vector<10x256xf32> to vector<2x256xf32>
    %139 = vector.extract_strided_slice %132 {offsets = [6, 0], sizes = [2, 256], strides = [1, 1]} : vector<10x256xf32> to vector<2x256xf32>
    %140 = arith.addf %138, %139 : vector<2x256xf32>
    %141 = vector.extract_strided_slice %132 {offsets = [8, 0], sizes = [2, 256], strides = [1, 1]} : vector<10x256xf32> to vector<2x256xf32>
    %142 = arith.addf %140, %141 : vector<2x256xf32>
    %cst_35 = arith.constant 1.000000e+01 : f32
    %143 = vector.broadcast %cst_35 : f32 to vector<2x256xf32>
    %144 = arith.mulf %142, %143 : vector<2x256xf32>
    %145 = vector.broadcast %134 : vector<1x256xf32> to vector<2x256xf32>
    %146 = arith.addf %144, %145 : vector<2x256xf32>
    %c6 = arith.constant 6 : index
    %c0_36 = arith.constant 0 : index
    %147 = vector.load %arg4[%c6, %c0_36] : memref<16x256xf32, #tpu.memory_space<vmem>>, vector<2x256xf32>
    tpu.vector_store %arg4[%c6, %c0_36], %137 {strides = array<i32>} : memref<16x256xf32, #tpu.memory_space<vmem>>, vector<2x256xf32>,
    %c6_37 = arith.constant 6 : index
    %c0_38 = arith.constant 0 : index
    %148 = vector.load %arg5[%c6_37, %c0_38] : memref<16x256xf32, #tpu.memory_space<vmem>>, vector<2x256xf32>
    tpu.vector_store %arg5[%c6_37, %c0_38], %146 {strides = array<i32>} : memref<16x256xf32, #tpu.memory_space<vmem>>, vector<2x256xf32>,
    %c255_i32 = arith.constant 255 : i32
    %149 = tpu.dynamic_rotate %0 by %c255_i32 dim 1 : vector<12x256xf32>, i32 -> vector<12x256xf32>
    %150 = vector.extract_strided_slice %149 {offsets = [0, 0], sizes = [1, 256], strides = [1, 1]} : vector<12x256xf32> to vector<1x256xf32>
    %151 = vector.extract_strided_slice %149 {offsets = [1, 0], sizes = [1, 256], strides = [1, 1]} : vector<12x256xf32> to vector<1x256xf32>
    %152 = arith.subf %150, %1 : vector<1x256xf32>
    %153 = math.absf %152 : vector<1x256xf32>
    %cst_39 = arith.constant 1.500000e+00 : f32
    %154 = vector.broadcast %cst_39 : f32 to vector<1x256xf32>
    %155 = arith.cmpf olt, %153, %154 : vector<1x256xf32>
    %156 = arith.subf %151, %2 : vector<1x256xf32>
    %157 = math.absf %156 : vector<1x256xf32>
    %cst_40 = arith.constant 1.500000e+00 : f32
    %158 = vector.broadcast %cst_40 : f32 to vector<1x256xf32>
    %159 = arith.cmpf olt, %157, %158 : vector<1x256xf32>
    %160 = arith.andi %155, %159 : vector<1x256xi1>
    %cst_41 = arith.constant 1.000000e+00 : f32
    %cst_42 = arith.constant 0.000000e+00 : f32
    %161 = vector.broadcast %cst_41 : f32 to vector<1x256xf32>
    %162 = vector.broadcast %cst_42 : f32 to vector<1x256xf32>
    %163 = arith.select %160, %161, %162 : vector<1x256xi1>, vector<1x256xf32>
    %164 = vector.extract_strided_slice %149 {offsets = [2, 0], sizes = [10, 256], strides = [1, 1]} : vector<12x256xf32> to vector<10x256xf32>
    %165 = vector.broadcast %163 : vector<1x256xf32> to vector<10x256xf32>
    %166 = arith.mulf %164, %165 : vector<10x256xf32>
    %167 = arith.subf %166, %3 : vector<10x256xf32>
    %168 = arith.mulf %167, %167 : vector<10x256xf32>
    %cst_43 = arith.constant 0.0177777782 : f32
    %169 = vector.broadcast %cst_43 : f32 to vector<1x256xf32>
    %170 = arith.select %160, %169, %4 : vector<1x256xi1>, vector<1x256xf32>
    %171 = vector.extract_strided_slice %168 {offsets = [0, 0], sizes = [2, 256], strides = [1, 1]} : vector<10x256xf32> to vector<2x256xf32>
    %172 = vector.extract_strided_slice %168 {offsets = [2, 0], sizes = [2, 256], strides = [1, 1]} : vector<10x256xf32> to vector<2x256xf32>
    %173 = arith.addf %171, %172 : vector<2x256xf32>
    %174 = vector.extract_strided_slice %168 {offsets = [4, 0], sizes = [2, 256], strides = [1, 1]} : vector<10x256xf32> to vector<2x256xf32>
    %175 = vector.extract_strided_slice %168 {offsets = [6, 0], sizes = [2, 256], strides = [1, 1]} : vector<10x256xf32> to vector<2x256xf32>
    %176 = arith.addf %174, %175 : vector<2x256xf32>
    %177 = vector.extract_strided_slice %168 {offsets = [8, 0], sizes = [2, 256], strides = [1, 1]} : vector<10x256xf32> to vector<2x256xf32>
    %178 = arith.addf %176, %177 : vector<2x256xf32>
    %cst_44 = arith.constant 1.000000e+01 : f32
    %179 = vector.broadcast %cst_44 : f32 to vector<2x256xf32>
    %180 = arith.mulf %178, %179 : vector<2x256xf32>
    %181 = vector.broadcast %170 : vector<1x256xf32> to vector<2x256xf32>
    %182 = arith.addf %180, %181 : vector<2x256xf32>
    %c8 = arith.constant 8 : index
    %c0_45 = arith.constant 0 : index
    %183 = vector.load %arg4[%c8, %c0_45] : memref<16x256xf32, #tpu.memory_space<vmem>>, vector<2x256xf32>
    tpu.vector_store %arg4[%c8, %c0_45], %173 {strides = array<i32>} : memref<16x256xf32, #tpu.memory_space<vmem>>, vector<2x256xf32>,
    %c8_46 = arith.constant 8 : index
    %c0_47 = arith.constant 0 : index
    %184 = vector.load %arg5[%c8_46, %c0_47] : memref<16x256xf32, #tpu.memory_space<vmem>>, vector<2x256xf32>
    tpu.vector_store %arg5[%c8_46, %c0_47], %182 {strides = array<i32>} : memref<16x256xf32, #tpu.memory_space<vmem>>, vector<2x256xf32>,
    %c241_i32 = arith.constant 241 : i32
    %185 = tpu.dynamic_rotate %0 by %c241_i32 dim 1 : vector<12x256xf32>, i32 -> vector<12x256xf32>
    %186 = vector.extract_strided_slice %185 {offsets = [0, 0], sizes = [1, 256], strides = [1, 1]} : vector<12x256xf32> to vector<1x256xf32>
    %187 = vector.extract_strided_slice %185 {offsets = [1, 0], sizes = [1, 256], strides = [1, 1]} : vector<12x256xf32> to vector<1x256xf32>
    %188 = arith.subf %186, %1 : vector<1x256xf32>
    %189 = math.absf %188 : vector<1x256xf32>
    %cst_48 = arith.constant 1.500000e+00 : f32
    %190 = vector.broadcast %cst_48 : f32 to vector<1x256xf32>
    %191 = arith.cmpf olt, %189, %190 : vector<1x256xf32>
    %192 = arith.subf %187, %2 : vector<1x256xf32>
    %193 = math.absf %192 : vector<1x256xf32>
    %cst_49 = arith.constant 1.500000e+00 : f32
    %194 = vector.broadcast %cst_49 : f32 to vector<1x256xf32>
    %195 = arith.cmpf olt, %193, %194 : vector<1x256xf32>
    %196 = arith.andi %191, %195 : vector<1x256xi1>
    %cst_50 = arith.constant 1.000000e+00 : f32
    %cst_51 = arith.constant 0.000000e+00 : f32
    %197 = vector.broadcast %cst_50 : f32 to vector<1x256xf32>
    %198 = vector.broadcast %cst_51 : f32 to vector<1x256xf32>
    %199 = arith.select %196, %197, %198 : vector<1x256xi1>, vector<1x256xf32>
    %200 = vector.extract_strided_slice %185 {offsets = [2, 0], sizes = [10, 256], strides = [1, 1]} : vector<12x256xf32> to vector<10x256xf32>
    %201 = vector.broadcast %199 : vector<1x256xf32> to vector<10x256xf32>
    %202 = arith.mulf %200, %201 : vector<10x256xf32>
    %203 = arith.subf %202, %3 : vector<10x256xf32>
    %204 = arith.mulf %203, %203 : vector<10x256xf32>
    %cst_52 = arith.constant 0.0355555564 : f32
    %205 = vector.broadcast %cst_52 : f32 to vector<1x256xf32>
    %206 = arith.select %196, %205, %4 : vector<1x256xi1>, vector<1x256xf32>
    %207 = vector.extract_strided_slice %204 {offsets = [0, 0], sizes = [2, 256], strides = [1, 1]} : vector<10x256xf32> to vector<2x256xf32>
    %208 = vector.extract_strided_slice %204 {offsets = [2, 0], sizes = [2, 256], strides = [1, 1]} : vector<10x256xf32> to vector<2x256xf32>
    %209 = arith.addf %207, %208 : vector<2x256xf32>
    %210 = vector.extract_strided_slice %204 {offsets = [4, 0], sizes = [2, 256], strides = [1, 1]} : vector<10x256xf32> to vector<2x256xf32>
    %211 = vector.extract_strided_slice %204 {offsets = [6, 0], sizes = [2, 256], strides = [1, 1]} : vector<10x256xf32> to vector<2x256xf32>
    %212 = arith.addf %210, %211 : vector<2x256xf32>
    %213 = vector.extract_strided_slice %204 {offsets = [8, 0], sizes = [2, 256], strides = [1, 1]} : vector<10x256xf32> to vector<2x256xf32>
    %214 = arith.addf %212, %213 : vector<2x256xf32>
    %cst_53 = arith.constant 1.000000e+01 : f32
    %215 = vector.broadcast %cst_53 : f32 to vector<2x256xf32>
    %216 = arith.mulf %214, %215 : vector<2x256xf32>
    %217 = vector.broadcast %206 : vector<1x256xf32> to vector<2x256xf32>
    %218 = arith.addf %216, %217 : vector<2x256xf32>
    %c10 = arith.constant 10 : index
    %c0_54 = arith.constant 0 : index
    %219 = vector.load %arg4[%c10, %c0_54] : memref<16x256xf32, #tpu.memory_space<vmem>>, vector<2x256xf32>
    tpu.vector_store %arg4[%c10, %c0_54], %209 {strides = array<i32>} : memref<16x256xf32, #tpu.memory_space<vmem>>, vector<2x256xf32>,
    %c10_55 = arith.constant 10 : index
    %c0_56 = arith.constant 0 : index
    %220 = vector.load %arg5[%c10_55, %c0_56] : memref<16x256xf32, #tpu.memory_space<vmem>>, vector<2x256xf32>
    tpu.vector_store %arg5[%c10_55, %c0_56], %218 {strides = array<i32>} : memref<16x256xf32, #tpu.memory_space<vmem>>, vector<2x256xf32>,
    %c240_i32 = arith.constant 240 : i32
    %221 = tpu.dynamic_rotate %0 by %c240_i32 dim 1 : vector<12x256xf32>, i32 -> vector<12x256xf32>
    %222 = vector.extract_strided_slice %221 {offsets = [0, 0], sizes = [1, 256], strides = [1, 1]} : vector<12x256xf32> to vector<1x256xf32>
    %223 = vector.extract_strided_slice %221 {offsets = [1, 0], sizes = [1, 256], strides = [1, 1]} : vector<12x256xf32> to vector<1x256xf32>
    %224 = arith.subf %222, %1 : vector<1x256xf32>
    %225 = math.absf %224 : vector<1x256xf32>
    %cst_57 = arith.constant 1.500000e+00 : f32
    %226 = vector.broadcast %cst_57 : f32 to vector<1x256xf32>
    %227 = arith.cmpf olt, %225, %226 : vector<1x256xf32>
    %228 = arith.subf %223, %2 : vector<1x256xf32>
    %229 = math.absf %228 : vector<1x256xf32>
    %cst_58 = arith.constant 1.500000e+00 : f32
    %230 = vector.broadcast %cst_58 : f32 to vector<1x256xf32>
    %231 = arith.cmpf olt, %229, %230 : vector<1x256xf32>
    %232 = arith.andi %227, %231 : vector<1x256xi1>
    %cst_59 = arith.constant 1.000000e+00 : f32
    %cst_60 = arith.constant 0.000000e+00 : f32
    %233 = vector.broadcast %cst_59 : f32 to vector<1x256xf32>
    %234 = vector.broadcast %cst_60 : f32 to vector<1x256xf32>
    %235 = arith.select %232, %233, %234 : vector<1x256xi1>, vector<1x256xf32>
    %236 = vector.extract_strided_slice %221 {offsets = [2, 0], sizes = [10, 256], strides = [1, 1]} : vector<12x256xf32> to vector<10x256xf32>
    %237 = vector.broadcast %235 : vector<1x256xf32> to vector<10x256xf32>
    %238 = arith.mulf %236, %237 : vector<10x256xf32>
    %239 = arith.subf %238, %3 : vector<10x256xf32>
    %240 = arith.mulf %239, %239 : vector<10x256xf32>
    %cst_61 = arith.constant 0.0177777782 : f32
    %241 = vector.broadcast %cst_61 : f32 to vector<1x256xf32>
    %242 = arith.select %232, %241, %4 : vector<1x256xi1>, vector<1x256xf32>
    %243 = vector.extract_strided_slice %240 {offsets = [0, 0], sizes = [2, 256], strides = [1, 1]} : vector<10x256xf32> to vector<2x256xf32>
    %244 = vector.extract_strided_slice %240 {offsets = [2, 0], sizes = [2, 256], strides = [1, 1]} : vector<10x256xf32> to vector<2x256xf32>
    %245 = arith.addf %243, %244 : vector<2x256xf32>
    %246 = vector.extract_strided_slice %240 {offsets = [4, 0], sizes = [2, 256], strides = [1, 1]} : vector<10x256xf32> to vector<2x256xf32>
    %247 = vector.extract_strided_slice %240 {offsets = [6, 0], sizes = [2, 256], strides = [1, 1]} : vector<10x256xf32> to vector<2x256xf32>
    %248 = arith.addf %246, %247 : vector<2x256xf32>
    %249 = vector.extract_strided_slice %240 {offsets = [8, 0], sizes = [2, 256], strides = [1, 1]} : vector<10x256xf32> to vector<2x256xf32>
    %250 = arith.addf %248, %249 : vector<2x256xf32>
    %cst_62 = arith.constant 1.000000e+01 : f32
    %251 = vector.broadcast %cst_62 : f32 to vector<2x256xf32>
    %252 = arith.mulf %250, %251 : vector<2x256xf32>
    %253 = vector.broadcast %242 : vector<1x256xf32> to vector<2x256xf32>
    %254 = arith.addf %252, %253 : vector<2x256xf32>
    %c12 = arith.constant 12 : index
    %c0_63 = arith.constant 0 : index
    %255 = vector.load %arg4[%c12, %c0_63] : memref<16x256xf32, #tpu.memory_space<vmem>>, vector<2x256xf32>
    tpu.vector_store %arg4[%c12, %c0_63], %245 {strides = array<i32>} : memref<16x256xf32, #tpu.memory_space<vmem>>, vector<2x256xf32>,
    %c12_64 = arith.constant 12 : index
    %c0_65 = arith.constant 0 : index
    %256 = vector.load %arg5[%c12_64, %c0_65] : memref<16x256xf32, #tpu.memory_space<vmem>>, vector<2x256xf32>
    tpu.vector_store %arg5[%c12_64, %c0_65], %254 {strides = array<i32>} : memref<16x256xf32, #tpu.memory_space<vmem>>, vector<2x256xf32>,
    %c239_i32 = arith.constant 239 : i32
    %257 = tpu.dynamic_rotate %0 by %c239_i32 dim 1 : vector<12x256xf32>, i32 -> vector<12x256xf32>
    %258 = vector.extract_strided_slice %257 {offsets = [0, 0], sizes = [1, 256], strides = [1, 1]} : vector<12x256xf32> to vector<1x256xf32>
    %259 = vector.extract_strided_slice %257 {offsets = [1, 0], sizes = [1, 256], strides = [1, 1]} : vector<12x256xf32> to vector<1x256xf32>
    %260 = arith.subf %258, %1 : vector<1x256xf32>
    %261 = math.absf %260 : vector<1x256xf32>
    %cst_66 = arith.constant 1.500000e+00 : f32
    %262 = vector.broadcast %cst_66 : f32 to vector<1x256xf32>
    %263 = arith.cmpf olt, %261, %262 : vector<1x256xf32>
    %264 = arith.subf %259, %2 : vector<1x256xf32>
    %265 = math.absf %264 : vector<1x256xf32>
    %cst_67 = arith.constant 1.500000e+00 : f32
    %266 = vector.broadcast %cst_67 : f32 to vector<1x256xf32>
    %267 = arith.cmpf olt, %265, %266 : vector<1x256xf32>
    %268 = arith.andi %263, %267 : vector<1x256xi1>
    %cst_68 = arith.constant 1.000000e+00 : f32
    %cst_69 = arith.constant 0.000000e+00 : f32
    %269 = vector.broadcast %cst_68 : f32 to vector<1x256xf32>
    %270 = vector.broadcast %cst_69 : f32 to vector<1x256xf32>
    %271 = arith.select %268, %269, %270 : vector<1x256xi1>, vector<1x256xf32>
    %272 = vector.extract_strided_slice %257 {offsets = [2, 0], sizes = [10, 256], strides = [1, 1]} : vector<12x256xf32> to vector<10x256xf32>
    %273 = vector.broadcast %271 : vector<1x256xf32> to vector<10x256xf32>
    %274 = arith.mulf %272, %273 : vector<10x256xf32>
    %275 = arith.subf %274, %3 : vector<10x256xf32>
    %276 = arith.mulf %275, %275 : vector<10x256xf32>
    %cst_70 = arith.constant 0.0355555564 : f32
    %277 = vector.broadcast %cst_70 : f32 to vector<1x256xf32>
    %278 = arith.select %268, %277, %4 : vector<1x256xi1>, vector<1x256xf32>
    %279 = vector.extract_strided_slice %276 {offsets = [0, 0], sizes = [2, 256], strides = [1, 1]} : vector<10x256xf32> to vector<2x256xf32>
    %280 = vector.extract_strided_slice %276 {offsets = [2, 0], sizes = [2, 256], strides = [1, 1]} : vector<10x256xf32> to vector<2x256xf32>
    %281 = arith.addf %279, %280 : vector<2x256xf32>
    %282 = vector.extract_strided_slice %276 {offsets = [4, 0], sizes = [2, 256], strides = [1, 1]} : vector<10x256xf32> to vector<2x256xf32>
    %283 = vector.extract_strided_slice %276 {offsets = [6, 0], sizes = [2, 256], strides = [1, 1]} : vector<10x256xf32> to vector<2x256xf32>
    %284 = arith.addf %282, %283 : vector<2x256xf32>
    %285 = vector.extract_strided_slice %276 {offsets = [8, 0], sizes = [2, 256], strides = [1, 1]} : vector<10x256xf32> to vector<2x256xf32>
    %286 = arith.addf %284, %285 : vector<2x256xf32>
    %cst_71 = arith.constant 1.000000e+01 : f32
    %287 = vector.broadcast %cst_71 : f32 to vector<2x256xf32>
    %288 = arith.mulf %286, %287 : vector<2x256xf32>
    %289 = vector.broadcast %278 : vector<1x256xf32> to vector<2x256xf32>
    %290 = arith.addf %288, %289 : vector<2x256xf32>
    %c14 = arith.constant 14 : index
    %c0_72 = arith.constant 0 : index
    %291 = vector.load %arg4[%c14, %c0_72] : memref<16x256xf32, #tpu.memory_space<vmem>>, vector<2x256xf32>
    tpu.vector_store %arg4[%c14, %c0_72], %281 {strides = array<i32>} : memref<16x256xf32, #tpu.memory_space<vmem>>, vector<2x256xf32>,
    %c14_73 = arith.constant 14 : index
    %c0_74 = arith.constant 0 : index
    %292 = vector.load %arg5[%c14_73, %c0_74] : memref<16x256xf32, #tpu.memory_space<vmem>>, vector<2x256xf32>
    tpu.vector_store %arg5[%c14_73, %c0_74], %290 {strides = array<i32>} : memref<16x256xf32, #tpu.memory_space<vmem>>, vector<2x256xf32>,
    %c0_75 = arith.constant 0 : index
    %c0_76 = arith.constant 0 : index
    %293 = vector.load %arg5[%c0_75, %c0_76] : memref<16x256xf32, #tpu.memory_space<vmem>>, vector<16x256xf32>
    %cst_77 = arith.constant 0.000000e+00 : f32
    %294 = vector.broadcast %cst_77 : f32 to vector<16x256xf32>
    %295 = arith.subf %294, %293 : vector<16x256xf32>
    %296 = math.exp %295 : vector<16x256xf32>
    %c0_78 = arith.constant 0 : index
    %c0_79 = arith.constant 0 : index
    %297 = vector.load %arg4[%c0_78, %c0_79] : memref<16x256xf32, #tpu.memory_space<vmem>>, vector<16x256xf32>
    %298 = arith.mulf %297, %296 : vector<16x256xf32>
    %cst_80 = arith.constant dense<0.000000e+00> : vector<256xf32>
    %299 = vector.multi_reduction <add>, %298, %cst_80 [0] : vector<16x256xf32> to vector<256xf32>
    %300 = vector.shape_cast %299 : vector<256xf32> to vector<1x256xf32>
    %cst_81 = arith.constant dense<0.000000e+00> : vector<1xf32>
    %301 = vector.multi_reduction <add>, %300, %cst_81 [1] : vector<1x256xf32> to vector<1xf32>
    %302 = vector.shape_cast %301 : vector<1xf32> to vector<1x1xf32>
    %303 = vector.shape_cast %302 : vector<1x1xf32> to vector<1x1xf32>
    %304 = vector.broadcast %303 : vector<1x1xf32> to vector<1x128xf32>
    %c0_82 = arith.constant 0 : index
    %c0_83 = arith.constant 0 : index
    %305 = vector.load %arg3[%c0_82, %c0_83] : memref<1x128xf32, #tpu.memory_space<vmem>>, vector<1x128xf32>
    tpu.vector_store %arg3[%c0_82, %c0_83], %304 {strides = array<i32>} : memref<1x128xf32, #tpu.memory_space<vmem>>, vector<1x128xf32>,
    return
  }
  func.func @transform_0(%arg0: i32) -> (i32, i32) {
    %c0_i32 = arith.constant 0 : i32
    %c0_i32_0 = arith.constant 0 : i32
    %c0_i32_1 = arith.constant 0 : i32
    return %c0_i32, %c0_i32_0 : i32, i32
  }
  func.func @transform_1(%arg0: i32) -> (i32, i32) {
    %c0_i32 = arith.constant 0 : i32
    %c0_i32_0 = arith.constant 0 : i32
    %c0_i32_1 = arith.constant 0 : i32
    return %c0_i32, %c0_i32_0 : i32, i32
  }
  func.func @transform_2(%arg0: i32) -> (i32, i32) {
    %c0_i32 = arith.constant 0 : i32
    %c0_i32_0 = arith.constant 0 : i32
    %c0_i32_1 = arith.constant 0 : i32
    return %c0_i32, %c0_i32_0 : i32, i32
  }
}

</mosaic_0001>

<bundles_post_ra>
// kernel: tpu_custom_call.1
= control target key start
LH: loop header
LB: loop body
LE: loop exit
PB: predicated region body
PF: predicated region fallthrough
CT: control target
= control target key end

     0   :  { %7 = vsyncpa [#allocation5], 0  ;;  %s1667_s0 = inlined_call_operand.hbm [shape: f32[12,256], index: 0, kind: input, shape index: {}]   ;;  %s1668_s1 = inlined_call_operand.vmem [shape: f32[1,256], index: 1, kind: input, shape index: {}]   ;;  %s1669_s2 = inlined_call_operand.hbm [shape: f32[1,128], index: 2, kind: output, shape index: {}]  }
   0x1   :  { %8 = vsyncpa [#allocation6], 0  ;;  %s956_s9 = smov [#allocation4]   ;;  %s908_s13 = scalar_lea.hbm %s1667_s0, 512 }
   0x2   :  { %s14_s10 = sshll.u32 %s956_s9, 4  ;;  %p909_p0 = scmp.ne.s32.totalorder %s1667_s0, %s908_s13  ;;  %s15_s10 = int_to_ptr.vmem [resolvable:$true] %s14_s10 }
   0x3   :  { %p912_p1 = scmp.lt.u32.totalorder %s908_s13, %s1667_s0 }
   0x5   :  { %p914_p2 = pnand %p912_p1, %p909_p0 }
   0x7   :  { %917 = shalt.err (!%p914_p2)
}
   0x8   :  { %s918_s18 = scalar_lea.vmem %s15_s10, 512  ;;  %p923_p4 = scmp.lt.s32.totalorder %s15_s10, %s15_s10 }
   0x9   :  { %p919_p3 = scmp.ne.s32.totalorder %s15_s10, %s918_s18  ;;  %p924_p5 = scmp.lt.s32.totalorder %s918_s18, %s918_s18 }
   0xb   :  { %p925_p6 = por %p924_p5, %p923_p4 }
   0xd   :  { %p926_p7 = pnand %p925_p6, %p919_p3 }
   0xf   :  { %929 = shalt.err (!%p926_p7)
}
  0x10   :  { %s957_s19 = smov 256   ;;  %s958_s20 = smov 16  }
  0x11   :  { %20 = dma.hbm_to_vmem [thread:$0]  %s1667_s0, 512, %s15_s10, [#allocation5], %s957_s19, %s957_s19, %s958_s20  }
  0x12   :  { %952 = dma.done.wait [#allocation5], 512  }
  0x13   :  { %953 = vsyncadd [#allocation5], 4294966784  ;;  %v997_v0 = vld [vmem:[#allocation4] sm:$0xff]  ;;  %s959_s23 = smov 17   ;;  %v1002_v1 = vld [vmem:[#allocation4 + $0x8] sm:$0xff]  ;;  %s960_s24 = smov 15   ;;  %v39_v4 = vlaneseq }
  0x14   :  { %145 = vrot.lane.b32.xlu1 %v997_v0, %s958_s20  ;;  %31 = vrot.lane.b32.xlu0 %v997_v0, %s959_s23  ;;  %s961_s0 = smov 127   ;;  %s962_s25 = smov 113   ;;  %v1019_v2 = vld [vmem:[#allocation4 + $0x18] sm:$0xf]  ;;  %v1021_v3 = vld [vmem:[#allocation4 + $0x10] sm:$0xf] }
  0x15   :  { %s963_s26 = smov 112   ;;  %s964_s27 = smov 1   ;;  %v1041_v5 = vand.u32 127, %v39_v4  ;;  %v1045_v8 = vshrl.u32 %v39_v4, 7  ;;  %v1675_v29 = vmov 0   ;;  %v1673_v48 = vmov 0.0  }
  0x16   :  { %s965_s28 = smov 111   ;;  %v30_v39 = vld [vmem:[%s1668_s1] sm:$0x3]  ;;  %s968_s1 = smov [#allocation7]  }
  0x17   :  { %vm153_vm0 = vcmp.lt.s32.totalorder %v1041_v5, 16  ;;  %vm41_vm1 = vcmp.lt.s32.totalorder %v1041_v5, 17  ;;  %vm248_vm2 = vcmp.lt.s32.totalorder %v1041_v5, 15  ;;  %v1070_v19 = vsub.s32 0, %v1045_v8  ;;  %s876_s3 = sshll.u32 %s968_s1, 4  ;;  %s877_s3 = int_to_ptr.vmem [resolvable:$true] %s876_s3 }
  0x18   :  { %149 = vrot.lane.b32.xlu1 %v1002_v1, %s958_s20  ;;  %35 = vrot.lane.b32.xlu0 %v1002_v1, %s959_s23  ;;  %vm444_vm3 = vcmp.lt.s32.totalorder %v1041_v5, 127  ;;  %v89_v43 = vsub.s32 1, %v1045_v8  ;;  %s930_s4 = scalar_lea.vmem %s877_s3, 16  ;;  %s934_s5 = scalar_lea.vmem %s877_s3, 32 }
  0x19   :  { %v1107_v46 = vrot.slane %v30_v39, %v1070_v19  ;;  %p931_p8 = scmp.ne.s32.totalorder %s877_s3, %s930_s4  ;;  %p935_p9 = scmp.lt.s32.totalorder %s877_s3, %s877_s3 }
  0x1a   :  { %v1147_v60 = vrot.slane %v30_v39, %v89_v43  ;;  %p936_p10 = scmp.lt.s32.totalorder %s934_s5, %s930_s4 }
  0x1b   :  { %1691 = vst [vmem:[#allocation10_spill] sm:$0xff] %v1107_v46 }
  0x1c   :  { %244 = vrot.lane.b32.xlu1 %v1002_v1, %s960_s24  ;;  %240 = vrot.lane.b32.xlu0 %v997_v0, %s960_s24  ;;  %1698 = vst [vmem:[#allocation11_spill] sm:$0xff] %v1147_v60  ;;  %p937_p11 = por %p936_p10, %p935_p9 }
  0x1e   :  { %p938_p12 = pnand %p937_p11, %p931_p8 }
  0x20   :  { %440 = vrot.lane.b32.xlu1 %v1002_v1, %s961_s0  ;;  %436 = vrot.lane.b32.xlu0 %v997_v0, %s961_s0 }
  0x24   :  { %541 = vrot.lane.b32.xlu1 %v1002_v1, %s962_s25  ;;  %537 = vrot.lane.b32.xlu0 %v997_v0, %s962_s25 }
  0x28   :  { %636 = vrot.lane.b32.xlu1 %v1002_v1, %s963_s26  ;;  %632 = vrot.lane.b32.xlu0 %v997_v0, %s963_s26 }
  0x2c   :  { %345 = vrot.lane.b32.xlu1 %v1002_v1, %s964_s27  ;;  %341 = vrot.lane.b32.xlu0 %v997_v0, %s964_s27 }
  0x30   :  { %737 = vrot.lane.b32.xlu1 %v1002_v1, %s965_s28  ;;  %733 = vrot.lane.b32.xlu0 %v997_v0, %s965_s28 }
  0x34   :  { %37 = vrot.lane.b32.xlu1 %v1019_v2, %s959_s23  ;;  %33 = vrot.lane.b32.xlu0 %v1021_v3, %s959_s23 }
  0x38   :  { %151 = vrot.lane.b32.xlu1 %v1019_v2, %s958_s20  ;;  %147 = vrot.lane.b32.xlu0 %v1021_v3, %s958_s20 }
  0x3c   :  { %246 = vrot.lane.b32.xlu1 %v1019_v2, %s960_s24  ;;  %242 = vrot.lane.b32.xlu0 %v1021_v3, %s960_s24 }
  0x40   :  { %442 = vrot.lane.b32.xlu1 %v1019_v2, %s961_s0  ;;  %438 = vrot.lane.b32.xlu0 %v1021_v3, %s961_s0 }
  0x44   :  { %543 = vrot.lane.b32.xlu1 %v1019_v2, %s962_s25  ;;  %539 = vrot.lane.b32.xlu0 %v1021_v3, %s962_s25 }
  0x48   :  { %638 = vrot.lane.b32.xlu1 %v1019_v2, %s963_s26  ;;  %634 = vrot.lane.b32.xlu0 %v1021_v3, %s963_s26 }
  0x4c   :  { %347 = vrot.lane.b32.xlu1 %v1019_v2, %s964_s27  ;;  %343 = vrot.lane.b32.xlu0 %v1021_v3, %s964_s27 }
  0x50   :  { %739 = vrot.lane.b32.xlu1 %v1019_v2, %s965_s28  ;;  %735 = vrot.lane.b32.xlu0 %v1021_v3, %s965_s28 }
  0x86   :  { %v146_v6 = vpop.permute.xlu1 %145  ;;  %v32_v7 = vpop.permute.xlu0 %31 }
  0x8a   :  { %v150_v9 = vpop.permute.xlu1 %149  ;;  %v36_v10 = vpop.permute.xlu0 %35 }
  0x8b   :  { %v1050_v11 = vsel %vm153_vm0, %v146_v6, %v150_v9  ;;  %v156_v12 = vsel %vm153_vm0, %v150_v9, %v146_v6  ;;  %v1056_v13 = vsel %vm41_vm1, %v32_v7, %v36_v10  ;;  %v1060_v14 = vsel %vm41_vm1, %v36_v10, %v32_v7 }
  0x8c   :  { %v158_v15 = vsub.f32 %v156_v12, %v997_v0  ;;  %v159_v16 = vsub.f32 %v1050_v11, %v1002_v1  ;;  %v46_v17 = vsub.f32 %v1060_v14, %v997_v0  ;;  %v47_v18 = vsub.f32 %v1056_v13, %v1002_v1 }
  0x8e   :  { %v160_v20 = vand.u32 2147483647, %v158_v15  ;;  %v161_v21 = vand.u32 2147483647, %v159_v16  ;;  %v48_v22 = vand.u32 2147483647, %v46_v17  ;;  %v245_v23 = vpop.permute.xlu1 %244  ;;  %v241_v24 = vpop.permute.xlu0 %240 }
  0x8f   :  { %v49_v25 = vand.u32 2147483647, %v47_v18  ;;  %v1074_v26 = vsel %vm248_vm2, %v241_v24, %v245_v23  ;;  %v1078_v27 = vsel %vm248_vm2, %v245_v23, %v241_v24 }
  0x90   :  { %vm162_vm4 = vcmp.lt.f32.partialorder %v160_v20, 1.5  ;;  %vm163_vm5 = vcmp.lt.f32.partialorder %v161_v21, 1.5  ;;  %vm50_vm6 = vcmp.lt.f32.partialorder %v48_v22, 1.5  ;;  %v253_v28 = vsub.f32 %v1078_v27, %v997_v0 }
  0x91   :  { %v164_v30 = vsel %vm162_vm4, 1, %v1675_v29  ;;  %v165_v31 = vsel %vm163_vm5, 1, %v1675_v29  ;;  %vm51_vm7 = vcmp.lt.f32.partialorder %v49_v25, 1.5  ;;  %v52_v32 = vsel %vm50_vm6, 1, %v1675_v29 }
  0x92   :  { %v166_v33 = vrot.slane %v164_v30, 1  ;;  %v167_v34 = vrot.slane %v165_v31, 1  ;;  %v53_v35 = vsel %vm51_vm7, 1, %v1675_v29  ;;  %v54_v36 = vrot.slane %v52_v32, 1  ;;  %v441_v37 = vpop.permute.xlu1 %440  ;;  %v437_v38 = vpop.permute.xlu0 %436 }
  0x93   :  { %v55_v40 = vrot.slane %v53_v35, 1  ;;  %v254_v41 = vsub.f32 %v1074_v26, %v1002_v1  ;;  %v255_v42 = vand.u32 2147483647, %v253_v28  ;;  %v1104_v45 = vsel %vm444_vm3, %v437_v38, %v441_v37 }
  0x94   :  { %vm168_vm8 = vcmp.ne.s32.totalorder %v166_v33, 0  ;;  %vm169_vm9 = vcmp.ne.s32.totalorder %v167_v34, 0  ;;  %vm56_vm10 = vcmp.ne.s32.totalorder %v54_v36, 0  ;;  %v1130_v54 = vsel %vm444_vm3, %v441_v37, %v437_v38 }
  0x95   :  { %vm1098_vm11 = vmand %vm162_vm4, %vm168_vm8  ;;  %vm57_vm12 = vcmp.ne.s32.totalorder %v55_v40, 0  ;;  %vm257_vm13 = vcmp.lt.f32.partialorder %v255_v42, 1.5  ;;  %v256_v53 = vand.u32 2147483647, %v254_v41  ;;  %v449_v59 = vsub.f32 %v1104_v45, %v997_v0 }
  0x96   :  { %vm1110_vm14 = vmand %vm163_vm5, %vm169_vm9  ;;  %v172_v49 = vsel %vm1098_vm11, 1.0, %v1673_v48  ;;  %v259_v58 = vsel %vm257_vm13, 1, %v1675_v29  ;;  %v450_v7 = vsub.f32 %v1130_v54, %v1002_v1  ;;  %vm1672_vm5 = vcmp.lt.s32.totalorder %v1041_v5, 113  ;;  %v542_v35 = vpop.permute.xlu1 %541  ;;  %v538_v36 = vpop.permute.xlu0 %537 }
  0x97   :  { %v173_v50 = vsel %vm1110_vm14, 1.0, %v1673_v48  ;;  %v1121_v51 = vrot.slane %v172_v49, %v1070_v19  ;;  %vm1124_vm15 = vmand %vm50_vm6, %vm56_vm10  ;;  %vm258_vm6 = vcmp.lt.f32.partialorder %v256_v53, 1.5  ;;  %v261_v10 = vrot.slane %v259_v58, 1 }
  0x98   :  { %v1133_v55 = vrot.slane %v173_v50, %v1070_v19  ;;  %vm1136_vm4 = vmand %vm51_vm7, %vm57_vm12  ;;  %v60_v57 = vsel %vm1124_vm15, 1.0, %v1673_v48  ;;  %v260_v15 = vsel %vm258_vm6, 1, %v1675_v29  ;;  %v451_v16 = vand.u32 2147483647, %v449_v59 }
  0x99   :  { %v182_v61 = vmul.f32 %v1121_v51, %v156_v12  ;;  %v61_v62 = vsel %vm1136_vm4, 1.0, %v1673_v48  ;;  %v1154_v63 = vrot.slane %v60_v57, %v1070_v19  ;;  %v262_v20 = vrot.slane %v260_v15, 1 }
  0x9a   :  { %v183_v4 = vmul.f32 %v1133_v55, %v1050_v11  ;;  %v1159_v6 = vrot.slane %v61_v62, %v1070_v19  ;;  %vm263_vm7 = vcmp.ne.s32.totalorder %v261_v10, 0  ;;  %v452_v23 = vand.u32 2147483647, %v450_v7 }
  0x9b   :  { %v186_v8 = vsub.f32 %v182_v61, %v997_v0  ;;  %v70_v9 = vmul.f32 %v1154_v63, %v1060_v14  ;;  %v194_v14 = vsel %vm1098_vm11, 0.017777778, %v1107_v46  ;;  %vm1182_vm8 = vmand %vm257_vm13, %vm263_vm7  ;;  %vm1670_vm9 = vcmp.lt.s32.totalorder %v1041_v5, 112 }
  0x9c   :  { %v187_v12 = vsub.f32 %v183_v4, %v1002_v1  ;;  %v71_v11 = vmul.f32 %v1159_v6, %v1056_v13  ;;  %vm264_vm10 = vcmp.ne.s32.totalorder %v262_v20, 0  ;;  %v267_v28 = vsel %vm1182_vm8, 1.0, %v1673_v48 }
  0x9d   :  { %v1172_v17 = vmul.f32 %v186_v8, %v186_v8  ;;  %v74_v18 = vsub.f32 %v70_v9, %v997_v0  ;;  %v195_v30 = vsel %vm1110_vm14, 0.017777778, %v1147_v60  ;;  %vm1200_vm11 = vmand %vm258_vm6, %vm264_vm10  ;;  %v1205_v34 = vrot.slane %v267_v28, %v1070_v19  ;;  %v637_v8 = vpop.permute.xlu1 %636  ;;  %v633_v9 = vpop.permute.xlu0 %632 }
  0x9e   :  { %v1175_v21 = vmul.f32 %v187_v12, %v187_v12  ;;  %v75_v22 = vsub.f32 %v71_v11, %v1002_v1  ;;  %v268_v39 = vsel %vm1200_vm11, 1.0, %v1673_v48  ;;  %vm453_vm12 = vcmp.lt.f32.partialorder %v451_v16, 1.5 }
  0x9f   :  { %v198_v24 = vrot.slane %v1172_v17, 2  ;;  %v1188_v25 = vmul.f32 %v74_v18, %v74_v18  ;;  %v1215_v42 = vrot.slane %v268_v39, %v1070_v19  ;;  %v277_v43 = vmul.f32 %v1205_v34, %v1078_v27 }
  0xa0   :  { %v199_v31 = vrot.slane %v1175_v21, 2  ;;  %v1197_v32 = vmul.f32 %v75_v22, %v75_v22  ;;  %v1220_v44 = vrot.slane %v194_v14, %v1070_v19  ;;  %v93_v47 = vsel %vm1124_vm15, 0.035555556, %v1107_v46 }
  0xa1   :  { %v202_v37 = vadd.f32 %v198_v24, %v1172_v17  ;;  %v97_v38 = vrot.slane %v1188_v25, 2  ;;  %vm454_vm13 = vcmp.lt.f32.partialorder %v452_v23, 1.5  ;;  %v278_v53 = vmul.f32 %v1215_v42, %v1074_v26 }
  0xa2   :  { %v203_v40 = vadd.f32 %v199_v31, %v1175_v21  ;;  %v98_v41 = vrot.slane %v1197_v32, 2  ;;  %v281_v57 = vsub.f32 %v277_v43, %v997_v0  ;;  %v455_v27 = vsel %vm453_vm12, 1, %v1675_v29 }
  0xa3   :  { %230 = vst [vmem:[#allocation2] sm:$0xc] %v202_v37  ;;  %v101_v49 = vadd.f32 %v97_v38, %v1188_v25  ;;  %v456_v59 = vsel %vm454_vm13, 1, %v1675_v29  ;;  %v457_v52 = vrot.slane %v455_v27, 1  ;;  %v1236_v61 = vsel %vm1672_vm5, %v538_v36, %v542_v35 }
  0xa4   :  { %231 = vst [vmem:[#allocation2 + $0x8] sm:$0xc] %v203_v40  ;;  %v102_v50 = vadd.f32 %v98_v41, %v1197_v32  ;;  %vm1671_vm14 = vcmp.lt.s32.totalorder %v1041_v5, 1  ;;  %v282_v4 = vsub.f32 %v278_v53, %v1002_v1  ;;  %v1240_v26 = vmul.f32 %v281_v57, %v281_v57  ;;  %v346_v53 = vpop.permute.xlu1 %345  ;;  %v342_v57 = vpop.permute.xlu0 %341 }
  0xa5   :  { %v131_v58 = vrot.slane %v101_v49, 2  ;;  %v458_v7 = vrot.slane %v456_v59, 1  ;;  %v94_v10 = vsel %vm1136_vm4, 0.035555556, %v1147_v60  ;;  %vm459_vm15 = vcmp.ne.s32.totalorder %v457_v52, 0 }
  0xa6   :  { %v132_v62 = vrot.slane %v102_v50, 2  ;;  %v1247_v12 = vsel %vm1672_vm5, %v542_v35, %v538_v36  ;;  %v550_v11 = vsub.f32 %v1236_v61, %v997_v0  ;;  %v1251_v15 = vmul.f32 %v282_v4, %v282_v4  ;;  %vm1255_vm7 = vmand %vm453_vm12, %vm459_vm15 }
  0xa7   :  { %135 = vst [vmem:[#allocation2] sm:$0x3] %v131_v58  ;;  %v293_v18 = vrot.slane %v1240_v26, 2  ;;  %vm460_vm6 = vcmp.ne.s32.totalorder %v458_v7, 0  ;;  %v551_v56 = vsub.f32 %v1247_v12, %v1002_v1  ;;  %v1262_v14 = vrot.slane %v195_v30, %v1070_v19 }
  0xa8   :  { %136 = vst [vmem:[#allocation2 + $0x8] sm:$0x3] %v132_v62  ;;  %vm1265_vm4 = vmand %vm454_vm13, %vm460_vm6  ;;  %v463_v24 = vsel %vm1255_vm7, 1.0, %v1673_v48  ;;  %v552_v16 = vand.u32 2147483647, %v550_v11  ;;  %v1274_v28 = vsel %vm1670_vm9, %v633_v9, %v637_v8  ;;  %v294_v31 = vrot.slane %v1251_v15, 2 }
  0xa9   :  { %v297_v35 = vadd.f32 %v293_v18, %v1240_v26  ;;  %v464_v23 = vsel %vm1265_vm4, 1.0, %v1673_v48  ;;  %v1282_v30 = vrot.slane %v463_v24, %v1070_v19  ;;  %v1285_v36 = vrot.slane %v93_v47, %v1070_v19 }
  0xaa   :  { %v1288_v37 = vrot.slane %v94_v10, %v1070_v19  ;;  %v1291_v38 = vrot.slane %v464_v23, %v1070_v19  ;;  %v553_v39 = vand.u32 2147483647, %v551_v56  ;;  %v298_v40 = vadd.f32 %v294_v31, %v1251_v15 }
  0xab   :  { %v327_v41 = vrot.slane %v297_v35, 6  ;;  %v473_v43 = vmul.f32 %v1282_v30, %v1104_v45  ;;  %v1298_v49 = vsel %vm1670_vm9, %v637_v8, %v633_v9  ;;  %vm554_vm10 = vcmp.lt.f32.partialorder %v552_v16, 1.5 }
  0xac   :  { %v474_v47 = vmul.f32 %v1291_v38, %v1130_v54  ;;  %vm555_vm12 = vcmp.lt.f32.partialorder %v553_v39, 1.5  ;;  %v645_v50 = vsub.f32 %v1274_v28, %v997_v0  ;;  %v328_v27 = vrot.slane %v298_v40, 6 }
  0xad   :  { %331 = vst [vmem:[#allocation2] sm:$0x30] %v327_v41  ;;  %v477_v58 = vsub.f32 %v473_v43, %v997_v0  ;;  %v556_v45 = vsel %vm554_vm10, 1, %v1675_v29  ;;  %v557_v59 = vsel %vm555_vm12, 1, %v1675_v29  ;;  %vm741_vm13 = vcmp.lt.s32.totalorder %v1041_v5, 111 }
  0xae   :  { %v478_v54 = vsub.f32 %v474_v47, %v1002_v1  ;;  %v558_v52 = vrot.slane %v556_v45, 1  ;;  %v559_v62 = vrot.slane %v557_v59, 1  ;;  %v646_v4 = vsub.f32 %v1298_v49, %v1002_v1  ;;  %332 = vst [vmem:[#allocation2 + $0x8] sm:$0x30] %v328_v27 }
  0xaf   :  { %v1313_v7 = vmul.f32 %v477_v58, %v477_v58  ;;  %v647_v8 = vand.u32 2147483647, %v645_v50  ;;  %v1317_v9 = vsel %vm1671_vm14, %v342_v57, %v346_v53  ;;  %v1321_v10 = vsel %vm1671_vm14, %v346_v53, %v342_v57 }
  0xb0   :  { %v1323_v11 = vmul.f32 %v478_v54, %v478_v54  ;;  %vm560_vm15 = vcmp.ne.s32.totalorder %v558_v52, 0  ;;  %vm561_vm6 = vcmp.ne.s32.totalorder %v559_v62, 0  ;;  %v648_v18 = vand.u32 2147483647, %v646_v4  ;;  %v738_v54 = vpop.permute.xlu1 %737  ;;  %v734_v52 = vpop.permute.xlu0 %733 }
  0xb1   :  { %v289_v56 = vsel %vm1182_vm8, 0.035555556, %v1107_v46  ;;  %v290_v24 = vsel %vm1200_vm11, 0.035555556, %v1147_v60  ;;  %v489_v31 = vrot.slane %v1313_v7, 2  ;;  %vm1333_vm9 = vmand %vm554_vm10, %vm560_vm15  ;;  %vm649_vm14 = vcmp.lt.f32.partialorder %v647_v8, 1.5 }
  0xb2   :  { %v490_v23 = vrot.slane %v1323_v11, 2  ;;  %vm1339_vm5 = vmand %vm555_vm12, %vm561_vm6  ;;  %v564_v13 = vsel %vm1333_vm9, 1.0, %v1673_v48  ;;  %vm650_vm8 = vcmp.lt.f32.partialorder %v648_v18, 1.5  ;;  %v354_v33 = vsub.f32 %v1321_v10, %v997_v0 }
  0xb3   :  { %v493_v16 = vadd.f32 %v489_v31, %v1313_v7  ;;  %v565_v41 = vsel %vm1339_vm5, 1.0, %v1673_v48  ;;  %v1353_v39 = vrot.slane %v564_v13, %v1070_v19  ;;  %v355_v43 = vsub.f32 %v1317_v9, %v1002_v1 }
  0xb4   :  { %v1358_v47 = vrot.slane %v289_v56, %v1070_v19  ;;  %v1361_v50 = vrot.slane %v290_v24, %v1070_v19  ;;  %v494_v53 = vadd.f32 %v490_v23, %v1323_v11  ;;  %v1365_v57 = vrot.slane %v565_v41, %v1070_v19 }
  0xb5   :  { %v523_v27 = vrot.slane %v493_v16, 2  ;;  %v574_v58 = vmul.f32 %v1353_v39, %v1236_v61  ;;  %v651_v45 = vsel %vm649_vm14, 1, %v1675_v29  ;;  %v652_v59 = vsel %vm650_vm8, 1, %v1675_v29 }
  0xb6   :  { %v524_v62 = vrot.slane %v494_v53, 2  ;;  %v575_v4 = vmul.f32 %v1365_v57, %v1247_v12  ;;  %v653_v56 = vrot.slane %v651_v45, 1  ;;  %v654_v24 = vrot.slane %v652_v59, 1 }
  0xb7   :  { %v485_v31 = vsel %vm1255_vm7, 0.017777778, %v1107_v46  ;;  %527 = vst [vmem:[#allocation2 + $0x10] sm:$0x3] %v523_v27  ;;  %v578_v61 = vsub.f32 %v574_v58, %v997_v0  ;;  %v356_v23 = vand.u32 2147483647, %v354_v33  ;;  %v1382_v41 = vsel %vm741_vm13, %v734_v52, %v738_v54 }
  0xb8   :  { %v357_v13 = vand.u32 2147483647, %v355_v43  ;;  %528 = vst [vmem:[#allocation2 + $0x18] sm:$0x3] %v524_v62  ;;  %v579_v16 = vsub.f32 %v575_v4, %v1002_v1  ;;  %vm655_vm11 = vcmp.ne.s32.totalorder %v653_v56, 0  ;;  %vm656_vm10 = vcmp.ne.s32.totalorder %v654_v24, 0 }
  0xb9   :  { %v486_v12 = vsel %vm1265_vm4, 0.017777778, %v1147_v60  ;;  %v1387_v20 = vmul.f32 %v578_v61, %v578_v61  ;;  %vm1390_vm7 = vmand %vm649_vm14, %vm655_vm11  ;;  %vm358_vm12 = vcmp.lt.f32.partialorder %v356_v23, 1.5  ;;  %v1396_v33 = vsel %vm741_vm13, %v738_v54, %v734_v52 }
  0xba   :  { %v1398_v43 = vmul.f32 %v579_v16, %v579_v16  ;;  %vm1401_vm15 = vmand %vm650_vm8, %vm656_vm10  ;;  %v659_v22 = vsel %vm1390_vm7, 1.0, %v1673_v48  ;;  %vm359_vm14 = vcmp.lt.f32.partialorder %v357_v13, 1.5  ;;  %v360_v8 = vsel %vm358_vm12, 1, %v1675_v29 }
  0xbb   :  { %1711 = vst [vmem:[#allocation12_spill] sm:$0xff] %v1387_v20  ;;  %v590_v58 = vrot.slane %v1387_v20, 2  ;;  %v660_v45 = vsel %vm1401_vm15, 1.0, %v1673_v48  ;;  %v1415_v18 = vrot.slane %v659_v22, %v1070_v19  ;;  %v746_v59 = vsub.f32 %v1382_v41, %v997_v0 }
  0xbc   :  { %1714 = vst [vmem:[#allocation13_spill] sm:$0xff] %v1398_v43  ;;  %v1420_v54 = vrot.slane %v485_v31, %v1070_v19  ;;  %v1423_v52 = vrot.slane %v486_v12, %v1070_v19  ;;  %v591_v62 = vrot.slane %v1398_v43, 2  ;;  %v1427_v4 = vrot.slane %v660_v45, %v1070_v19 }
  0xbd   :  { %v594_v56 = vadd.f32 %v590_v58, %v1387_v20  ;;  %v669_v24 = vmul.f32 %v1415_v18, %v1274_v28  ;;  %v361_v61 = vsel %vm359_vm14, 1, %v1675_v29  ;;  %v362_v16 = vrot.slane %v360_v8, 1 }
  0xbe   :  { %1717 = vst [vmem:[#allocation14_spill] sm:$0xff] %v1420_v54  ;;  %1718 = vst [vmem:[#allocation15_spill] sm:$0xff] %v1423_v52  ;;  %v595_v31 = vadd.f32 %v591_v62, %v1398_v43  ;;  %v670_v12 = vmul.f32 %v1427_v4, %v1298_v49  ;;  %v363_v22 = vrot.slane %v361_v61, 1  ;;  %v747_v48 = vsub.f32 %v1396_v33, %v1002_v1  ;;  %v38_v61 = vpop.permute.xlu1 %37 }
  0xbf   :  { %v586_v58 = vsel %vm1333_vm9, 0.035555556, %v1107_v46  ;;  %622 = vst [vmem:[#allocation2 + $0x10] sm:$0xc] %v594_v56  ;;  %v673_v28 = vsub.f32 %v669_v24, %v997_v0  ;;  %vm364_vm4 = vcmp.ne.s32.totalorder %v362_v16, 0  ;;  %v1719_v62 = vmov 0  ;;  %v34_v56 = vpop.permute.xlu0 %33 }
  0xc0   :  { %v748_v45 = vand.u32 2147483647, %v746_v59  ;;  %v587_v8 = vsel %vm1339_vm5, 0.035555556, %v1147_v60  ;;  %623 = vst [vmem:[#allocation2 + $0x18] sm:$0xc] %v595_v31  ;;  %v674_v49 = vsub.f32 %v670_v12, %v1002_v1  ;;  %vm1448_vm8 = vmand %vm358_vm12, %vm364_vm4 }
  0xc1   :  { %vm365_vm6 = vcmp.ne.s32.totalorder %v363_v22, 0  ;;  %v1720_v62 = vsel %vm1448_vm8, 4294967295, %v1719_v62  ;;  %v749_v35 = vand.u32 2147483647, %v747_v48  ;;  %v1452_v29 = vmul.f32 %v673_v28, %v673_v28 }
  0xc2   :  { %1721 = vst [vmem:[#allocation16_spill] sm:$0xff] %v1720_v62  ;;  %v681_v59 = vsel %vm1390_vm7, 0.017777778, %v1107_v46  ;;  %vm1458_vm5 = vmand %vm359_vm14, %vm365_vm6  ;;  %v1723_v40 = vmov 0  ;;  %v1726_v24 = vmov 0.0   ;;  %vm750_vm9 = vcmp.lt.f32.partialorder %v748_v45, 1.5 }
  0xc3   :  { %1722 = vst [vmem:[#allocation17_spill] sm:$0xff] %v1452_v29  ;;  %v1724_v40 = vsel %vm1458_vm5, 4294967295, %v1723_v40  ;;  %v368_v23 = vsel %vm1448_vm8, 1.0, %v1726_v24  ;;  %v1465_v16 = vmul.f32 %v674_v49, %v674_v49  ;;  %v682_v48 = vsel %vm1401_vm15, 0.017777778, %v1147_v60  ;;  %v148_v43 = vpop.permute.xlu0 %147 }
  0xc4   :  { %1725 = vst [vmem:[#allocation18_spill] sm:$0xff] %v1724_v40  ;;  %v369_v53 = vsel %vm1458_vm5, 1.0, %v1726_v24  ;;  %v1474_v13 = vrot.slane %v368_v23, %v1070_v19  ;;  %v685_v31 = vrot.slane %v1452_v29, 2  ;;  %v43_v22 = vsel %vm41_vm1, %v34_v56, %v38_v61 }
  0xc5   :  { %v1478_v12 = vrot.slane %v369_v53, %v1070_v19  ;;  %v45_v28 = vsel %vm41_vm1, %v38_v61, %v34_v56  ;;  %v686_v27 = vrot.slane %v1465_v16, 2  ;;  %vm751_vm11 = vcmp.lt.f32.partialorder %v749_v35, 1.5 }
  0xc6   :  { %1727 = vst [vmem:[#allocation19_spill] sm:$0xff] %v1474_v13  ;;  %v378_v49 = vmul.f32 %v1474_v13, %v1321_v10  ;;  %v1728_v40 = vmov 0   ;;  %v689_v60 = vadd.f32 %v685_v31, %v1452_v29  ;;  %v72_v10 = vmul.f32 %v1154_v63, %v45_v28  ;;  %v152_v13 = vpop.permute.xlu1 %151 }
  0xc7   :  { %v752_v23 = vsel %vm750_vm9, 1, %v1728_v40  ;;  %v379_v53 = vmul.f32 %v1478_v12, %v1317_v9  ;;  %v753_v62 = vsel %vm751_vm11, 1, %v1728_v40  ;;  %v690_v61 = vadd.f32 %v686_v27, %v1465_v16 }
  0xc8   :  { %v754_v46 = vrot.slane %v752_v23, 1  ;;  %v382_v56 = vsub.f32 %v378_v49, %v997_v0  ;;  %v755_v52 = vrot.slane %v753_v62, 1  ;;  %v719_v20 = vrot.slane %v689_v60, 6 }
  0xc9   :  { %v383_v54 = vsub.f32 %v379_v53, %v1002_v1  ;;  %v73_v31 = vmul.f32 %v1159_v6, %v43_v22  ;;  %v720_v9 = vrot.slane %v690_v61, 6  ;;  %v1729_v40 = vmov 0  ;;  %v243_v61 = vpop.permute.xlu0 %242 }
  0xca   :  { %vm756_vm1 = vcmp.ne.s32.totalorder %v754_v46, 0  ;;  %v1499_v29 = vmul.f32 %v382_v56, %v382_v56  ;;  %vm757_vm10 = vcmp.ne.s32.totalorder %v755_v52, 0  ;;  %v76_v62 = vsub.f32 %v72_v10, %v1021_v3  ;;  %723 = vst [vmem:[#allocation2 + $0x10] sm:$0x30] %v719_v20  ;;  %v247_v53 = vpop.permute.xlu1 %246 }
  0xcb   :  { %vm1502_vm7 = vmand %vm750_vm9, %vm756_vm1  ;;  %v1508_v63 = vrot.slane %v586_v58, %v1070_v19  ;;  %v1510_v60 = vmul.f32 %v383_v54, %v383_v54  ;;  %v1732_v46 = vmov 0  ;;  %v77_v52 = vsub.f32 %v73_v31, %v1019_v2  ;;  %724 = vst [vmem:[#allocation2 + $0x18] sm:$0x30] %v720_v9 }
  0xcc   :  { %v1730_v40 = vsel %vm1502_vm7, 4294967295, %v1729_v40  ;;  %vm1513_vm12 = vmand %vm751_vm11, %vm757_vm10  ;;  %v760_v6 = vsel %vm1502_vm7, 1.0, %v1726_v24  ;;  %v1522_v45 = vrot.slane %v587_v8, %v1070_v19  ;;  %v394_v58 = vrot.slane %v1499_v29, 2 }
  0xcd   :  { %1731 = vst [vmem:[#allocation20_spill] sm:$0xff] %v1730_v40  ;;  %v1733_v46 = vsel %vm1513_vm12, 4294967295, %v1732_v46  ;;  %v761_v20 = vsel %vm1513_vm12, 1.0, %v1726_v24  ;;  %v1529_v54 = vrot.slane %v760_v6, %v1070_v19  ;;  %v1532_v35 = vrot.slane %v681_v59, %v1070_v19 }
  0xce   :  { %1734 = vst [vmem:[#allocation21_spill] sm:$0xff] %v1733_v46  ;;  %v1535_v22 = vrot.slane %v682_v48, %v1070_v19  ;;  %v395_v28 = vrot.slane %v1510_v60, 2  ;;  %v1539_v8 = vrot.slane %v761_v20, %v1070_v19  ;;  %v398_v27 = vadd.f32 %v394_v58, %v1499_v29 }
  0xcf   :  { %v770_v49 = vmul.f32 %v1529_v54, %v1382_v41  ;;  %v80_v24 = vmul.f32 %v76_v62, %v76_v62  ;;  %v81_v23 = vmul.f32 %v77_v52, %v77_v52  ;;  %v155_v56 = vsel %vm153_vm0, %v148_v43, %v152_v13 }
  0xd0   :  { %v399_v59 = vadd.f32 %v395_v28, %v1510_v60  ;;  %v771_v48 = vmul.f32 %v1539_v8, %v1396_v33  ;;  %v157_v10 = vsel %vm153_vm0, %v152_v13, %v148_v43  ;;  %v428_v31 = vrot.slane %v398_v27, 4 }
  0xd1   :  { %v774_v9 = vsub.f32 %v770_v49, %v997_v0  ;;  %v105_v6 = vrot.slane %v80_v24, 2  ;;  %v106_v41 = vrot.slane %v81_v23, 2  ;;  %v111_v58 = vrot.slane %v80_v24, 4 }
  0xd2   :  { %v429_v62 = vrot.slane %v399_v59, 4  ;;  %v775_v52 = vsub.f32 %v771_v48, %v1002_v1  ;;  %v112_v20 = vrot.slane %v81_v23, 4  ;;  %432 = vst [vmem:[#allocation2] sm:$0xc0] %v428_v31  ;;  %v184_v40 = vmul.f32 %v1121_v51, %v157_v10  ;;  %v439_v23 = vpop.permute.xlu0 %438 }
  0xd3   :  { %v1553_v28 = vmul.f32 %v774_v9, %v774_v9  ;;  %v109_v33 = vadd.f32 %v105_v6, %v1188_v25  ;;  %v110_v46 = vadd.f32 %v106_v41, %v1197_v32  ;;  %v185_v0 = vmul.f32 %v1133_v55, %v155_v56  ;;  %v443_v32 = vpop.permute.xlu1 %442 }
  0xd4   :  { %433 = vst [vmem:[#allocation2 + $0x8] sm:$0xc0] %v429_v62  ;;  %v1558_v43 = vmul.f32 %v775_v52, %v775_v52  ;;  %v250_v13 = vsel %vm248_vm2, %v243_v61, %v247_v53  ;;  %v252_v1 = vsel %vm248_vm2, %v247_v53, %v243_v61  ;;  %v188_v25 = vsub.f32 %v184_v40, %v1021_v3 }
  0xd5   :  { %v786_v27 = vrot.slane %v1553_v28, 2  ;;  %v115_v49 = vadd.f32 %v111_v58, %v109_v33  ;;  %v116_v24 = vadd.f32 %v112_v20, %v110_v46  ;;  %v189_v59 = vsub.f32 %v185_v0, %v1019_v2 }
  0xd6   :  { %v787_v51 = vrot.slane %v1558_v43, 2  ;;  %v279_v55 = vmul.f32 %v1205_v34, %v252_v1  ;;  %v280_v48 = vmul.f32 %v1215_v42, %v250_v13  ;;  %v192_v61 = vmul.f32 %v188_v25, %v188_v25 }
  0xd7   :  { %v790_v56 = vadd.f32 %v786_v27, %v1553_v28  ;;  %v117_v10 = vmul.f32 10.0, %v115_v49  ;;  %v118_v53 = vmul.f32 10.0, %v116_v24  ;;  %v193_v46 = vmul.f32 %v189_v59, %v189_v59  ;;  %v544_v27 = vpop.permute.xlu1 %543  ;;  %v540_v49 = vpop.permute.xlu0 %539 }
  0xd8   :  { %v791_v31 = vadd.f32 %v787_v51, %v1558_v43  ;;  %v283_v40 = vsub.f32 %v279_v55, %v1021_v3  ;;  %v284_v9 = vsub.f32 %v280_v48, %v1019_v2  ;;  %v206_v34 = vrot.slane %v192_v61, 2 }
  0xd9   :  { %v820_v6 = vrot.slane %v790_v56, 4  ;;  %v127_v41 = vadd.f32 %v1285_v36, %v117_v10  ;;  %v128_v62 = vadd.f32 %v1288_v37, %v118_v53  ;;  %v207_v42 = vrot.slane %v193_v46, 2 }
  0xda   :  { %v821_v52 = vrot.slane %v791_v31, 4  ;;  %v212_v58 = vrot.slane %v192_v61, 4  ;;  %v213_v20 = vrot.slane %v193_v46, 4  ;;  %v210_v13 = vadd.f32 %v206_v34, %v1172_v17 }
  0xdb   :  { %824 = vst [vmem:[#allocation2 + $0x10] sm:$0xc0] %v820_v6  ;;  %v139_v33 = vrot.slane %v127_v41, 6  ;;  %v140_v0 = vrot.slane %v128_v62, 6  ;;  %v287_v1 = vmul.f32 %v283_v40, %v283_v40  ;;  %v211_v24 = vadd.f32 %v207_v42, %v1175_v21  ;;  %v635_v62 = vpop.permute.xlu0 %634 }
  0xdc   :  { %825 = vst [vmem:[#allocation2 + $0x18] sm:$0xc0] %v821_v52  ;;  %v288_v25 = vmul.f32 %v284_v9, %v284_v9  ;;  %v446_v36 = vsel %vm444_vm3, %v439_v23, %v443_v32  ;;  %v448_v37 = vsel %vm444_vm3, %v443_v32, %v439_v23  ;;  %v216_v51 = vadd.f32 %v212_v58, %v210_v13 }
  0xdd   :  { %143 = vst [vmem:[#allocation3] sm:$0x3] %v139_v33  ;;  %144 = vst [vmem:[#allocation3 + $0x8] sm:$0x3] %v140_v0  ;;  %v301_v59 = vrot.slane %v287_v1, 2  ;;  %v307_v55 = vrot.slane %v287_v1, 4  ;;  %v475_v17 = vmul.f32 %v1282_v30, %v446_v36  ;;  %v217_v48 = vadd.f32 %v213_v20, %v211_v24 }
  0xde   :  { %v302_v56 = vrot.slane %v288_v25, 2  ;;  %v308_v10 = vrot.slane %v288_v25, 4  ;;  %v476_v53 = vmul.f32 %v1291_v38, %v448_v37  ;;  %v218_v21 = vmul.f32 10.0, %v216_v51 }
  0xdf   :  { %v305_v61 = vadd.f32 %v301_v59, %v1240_v26  ;;  %v479_v31 = vsub.f32 %v475_v17, %v1021_v3  ;;  %vm1735_vm0 = vcmp.lt.s32.totalorder %v1041_v5, 113  ;;  %v219_v23 = vmul.f32 10.0, %v217_v48  ;;  %v639_v26 = vpop.permute.xlu1 %638  ;;  %v344_v17 = vpop.permute.xlu0 %343 }
  0xe0   :  { %v547_v32 = vsel %vm1735_vm0, %v540_v49, %v544_v27  ;;  %v306_v46 = vadd.f32 %v302_v56, %v1251_v15  ;;  %v480_v40 = vsub.f32 %v476_v53, %v1019_v2  ;;  %vm1736_vm2 = vmmov %vm1735_vm0  ;;  %v228_v9 = vadd.f32 %v1220_v44, %v218_v21 }
  0xe1   :  { %v549_v30 = vsel %vm1736_vm2, %v544_v27, %v540_v49  ;;  %v311_v6 = vadd.f32 %v307_v55, %v305_v61  ;;  %v483_v38 = vmul.f32 %v479_v31, %v479_v31  ;;  %v576_v41 = vmul.f32 %v1353_v39, %v547_v32 }
  0xe2   :  { %v229_v34 = vadd.f32 %v1262_v14, %v219_v23  ;;  %v312_v52 = vadd.f32 %v308_v10, %v306_v46  ;;  %v484_v42 = vmul.f32 %v480_v40, %v480_v40  ;;  %v577_v58 = vmul.f32 %v1365_v57, %v549_v30  ;;  %v1739_v40 = vld [vmem:[#allocation14_spill] sm:$0xff] }
  0xe3   :  { %v234_v15 = vrot.slane %v228_v9, 4  ;;  %v313_v20 = vmul.f32 10.0, %v311_v6  ;;  %v497_v33 = vrot.slane %v483_v38, 2  ;;  %v503_v0 = vrot.slane %v483_v38, 4  ;;  %v1740_v9 = vld [vmem:[#allocation12_spill] sm:$0xff]  ;;  %v1741_v38 = vld [vmem:[#allocation13_spill] sm:$0xff] }
  0xe4   :  { %v235_v13 = vrot.slane %v229_v34, 4  ;;  %v314_v1 = vmul.f32 10.0, %v312_v52  ;;  %v498_v27 = vrot.slane %v484_v42, 2  ;;  %v504_v44 = vrot.slane %v484_v42, 4 }
  0xe5   :  { %238 = vst [vmem:[#allocation3] sm:$0xc] %v234_v15  ;;  %v323_v49 = vadd.f32 %v1358_v47, %v313_v20  ;;  %v501_v39 = vadd.f32 %v497_v33, %v1313_v7  ;;  %v580_v24 = vsub.f32 %v576_v41, %v1021_v3  ;;  %v581_v14 = vsub.f32 %v577_v58, %v1019_v2  ;;  %v348_v7 = vpop.permute.xlu1 %347  ;;  %v1743_v41 = vld [vmem:[#allocation15_spill] sm:$0xff] }
  0xe6   :  { %239 = vst [vmem:[#allocation3 + $0x8] sm:$0xc] %v235_v13  ;;  %v324_v57 = vadd.f32 %v1361_v50, %v314_v1  ;;  %v502_v25 = vadd.f32 %v498_v27, %v1323_v11  ;;  %vm1737_vm3 = vcmp.lt.s32.totalorder %v1041_v5, 112  ;;  %vm1742_vm14 = vcmp.lt.s32.totalorder %v1041_v5, 1  ;;  %v1745_v20 = vld [vmem:[#allocation19_spill] sm:$0xff]  ;;  %v736_v13 = vpop.permute.xlu0 %735 }
  0xe7   :  { %v642_v36 = vsel %vm1737_vm3, %v635_v62, %v639_v26  ;;  %vm1738_vm15 = vmmov %vm1737_vm3  ;;  %v335_v51 = vrot.slane %v323_v49, 2  ;;  %v507_v59 = vadd.f32 %v503_v0, %v501_v39  ;;  %v584_v47 = vmul.f32 %v580_v24, %v580_v24 }
  0xe8   :  { %v644_v37 = vsel %vm1738_vm15, %v639_v26, %v635_v62  ;;  %v585_v55 = vmul.f32 %v581_v14, %v581_v14  ;;  %v336_v48 = vrot.slane %v324_v57, 2  ;;  %v508_v56 = vadd.f32 %v504_v44, %v502_v25  ;;  %vm1744_vm4 = vmmov %vm1742_vm14  ;;  %v1746_v25 = vld [vmem:[#allocation17_spill] sm:$0xff] }
  0xe9   :  { %v671_v10 = vmul.f32 %v1415_v18, %v642_v36  ;;  %v672_v50 = vmul.f32 %v1427_v4, %v644_v37  ;;  %339 = vst [vmem:[#allocation3] sm:$0x30] %v335_v51  ;;  %v509_v11 = vmul.f32 10.0, %v507_v59  ;;  %v598_v53 = vrot.slane %v584_v47, 2  ;;  %v740_v0 = vpop.permute.xlu1 %739 }
  0xea   :  { %v599_v21 = vrot.slane %v585_v55, 2  ;;  %v604_v61 = vrot.slane %v584_v47, 4  ;;  %340 = vst [vmem:[#allocation3 + $0x8] sm:$0x30] %v336_v48  ;;  %v510_v31 = vmul.f32 10.0, %v508_v56  ;;  %v605_v32 = vrot.slane %v585_v55, 4 }
  0xeb   :  { %v675_v23 = vsub.f32 %v671_v10, %v1021_v3  ;;  %v676_v46 = vsub.f32 %v672_v50, %v1019_v2  ;;  %v519_v30 = vadd.f32 %v1739_v40, %v509_v11  ;;  %v602_v6 = vadd.f32 %v598_v53, %v1740_v9  ;;  %v1747_v53 = vld [vmem:[#allocation10_spill] sm:$0xff]  ;;  %v907_v40 = vld [vmem:[#allocation4 + $0x18] sm:$0xf] }
  0xec   :  { %v603_v18 = vadd.f32 %v599_v21, %v1741_v38  ;;  %v351_v4 = vsel %vm1742_vm14, %v344_v17, %v348_v7  ;;  %v520_v26 = vadd.f32 %v1743_v41, %v510_v31  ;;  %v353_v52 = vsel %vm1744_vm4, %v348_v7, %v344_v17  ;;  %v1749_v31 = vld [vmem:[#allocation11_spill] sm:$0xff]  ;;  %v844_v21 = vld [vmem:[#allocation2] sm:$0xff] }
  0xed   :  { %v679_v62 = vmul.f32 %v675_v23, %v675_v23  ;;  %v680_v34 = vmul.f32 %v676_v46, %v676_v46  ;;  %v531_v42 = vrot.slane %v519_v30, 6  ;;  %v608_v58 = vadd.f32 %v604_v61, %v602_v6 }
  0xee   :  { %v609_v15 = vadd.f32 %v605_v32, %v603_v18  ;;  %v380_v33 = vmul.f32 %v1745_v20, %v353_v52  ;;  %v532_v1 = vrot.slane %v520_v26, 6  ;;  %v381_v57 = vmul.f32 %v1478_v12, %v351_v4 }
  0xef   :  { %v693_v27 = vrot.slane %v679_v62, 2  ;;  %v694_v44 = vrot.slane %v680_v34, 2  ;;  %v699_v49 = vrot.slane %v679_v62, 4  ;;  %535 = vst [vmem:[#allocation3 + $0x10] sm:$0x3] %v531_v42  ;;  %v610_v39 = vmul.f32 10.0, %v608_v58 }
  0xf0   :  { %v611_v24 = vmul.f32 10.0, %v609_v15  ;;  %v700_v14 = vrot.slane %v680_v34, 4  ;;  %536 = vst [vmem:[#allocation3 + $0x18] sm:$0x3] %v532_v1  ;;  %v384_v51 = vsub.f32 %v380_v33, %v1021_v3  ;;  %v743_v59 = vsel %vm741_vm13, %v736_v13, %v740_v0 }
  0xf1   :  { %v697_v36 = vadd.f32 %v693_v27, %v1746_v25  ;;  %v698_v37 = vadd.f32 %v694_v44, %v1465_v16  ;;  %v620_v47 = vadd.f32 %v1508_v63, %v610_v39  ;;  %v385_v7 = vsub.f32 %v381_v57, %v1019_v2 }
  0xf2   :  { %v621_v55 = vadd.f32 %v1522_v45, %v611_v24  ;;  %v745_v17 = vsel %vm741_vm13, %v740_v0, %v736_v13  ;;  %v388_v56 = vmul.f32 %v384_v51, %v384_v51  ;;  %v772_v10 = vmul.f32 %v1529_v54, %v743_v59  ;;  %v906_v54 = vld [vmem:[#allocation4 + $0x10] sm:$0xf] }
  0xf3   :  { %v703_v12 = vadd.f32 %v699_v49, %v697_v36  ;;  %v704_v48 = vadd.f32 %v700_v14, %v698_v37  ;;  %v626_v16 = vrot.slane %v620_v47, 4  ;;  %v389_v3 = vmul.f32 %v385_v7, %v385_v7 }
  0xf4   :  { %v627_v50 = vrot.slane %v621_v55, 4  ;;  %v773_v11 = vmul.f32 %v1539_v8, %v745_v17  ;;  %v390_v63 = vsel %vm1448_vm8, 0.017777778, %v1747_v53  ;;  %v402_v2 = vrot.slane %v388_v56, 2 }
  0xf5   :  { %v705_v45 = vmul.f32 10.0, %v703_v12  ;;  %v706_v61 = vmul.f32 10.0, %v704_v48  ;;  %v391_v32 = vsel %vm1458_vm5, 0.017777778, %v1749_v31  ;;  %630 = vst [vmem:[#allocation3 + $0x10] sm:$0xc] %v626_v16  ;;  %v776_v46 = vsub.f32 %v772_v10, %v906_v54 }
  0xf6   :  { %631 = vst [vmem:[#allocation3 + $0x18] sm:$0xc] %v627_v50  ;;  %v403_v23 = vrot.slane %v389_v3, 2  ;;  %v777_v30 = vsub.f32 %v773_v11, %v907_v40  ;;  %v406_v6 = vadd.f32 %v402_v2, %v1499_v29  ;;  %v408_v38 = vrot.slane %v388_v56, 4  ;;  %v847_v2 = vld [vmem:[#allocation2 + $0x18] sm:$0xff] }
  0xf7   :  { %v715_v8 = vadd.f32 %v1532_v35, %v705_v45  ;;  %v716_v9 = vadd.f32 %v1535_v22, %v706_v61  ;;  %v409_v4 = vrot.slane %v389_v3, 4  ;;  %v780_v41 = vmul.f32 %v776_v46, %v776_v46  ;;  %v845_v61 = vld [vmem:[#allocation2 + $0x8] sm:$0xff] }
  0xf8   :  { %v407_v18 = vadd.f32 %v403_v23, %v1510_v60  ;;  %v781_v26 = vmul.f32 %v777_v30, %v777_v30  ;;  %v412_v52 = vadd.f32 %v408_v38, %v406_v6  ;;  %v419_v20 = vrot.slane %v390_v63, %v1070_v19  ;;  %v846_v63 = vld [vmem:[#allocation2 + $0x10] sm:$0xff] }
  0xf9   :  { %v727_v62 = vrot.slane %v715_v8, 2  ;;  %v728_v34 = vrot.slane %v716_v9, 2  ;;  %v794_v58 = vrot.slane %v780_v41, 2  ;;  %v423_v35 = vrot.slane %v391_v32, %v1070_v19 }
  0xfa   :  { %v413_v42 = vadd.f32 %v409_v4, %v407_v18  ;;  %v795_v15 = vrot.slane %v781_v26, 2  ;;  %v414_v22 = vmul.f32 10.0, %v412_v52  ;;  %v800_v29 = vrot.slane %v780_v41, 4 }
  0xfb   :  { %731 = vst [vmem:[#allocation3 + $0x10] sm:$0x30] %v727_v62  ;;  %732 = vst [vmem:[#allocation3 + $0x18] sm:$0x30] %v728_v34  ;;  %v798_v60 = vadd.f32 %v794_v58, %v1553_v28  ;;  %v801_v13 = vrot.slane %v781_v26, 4 }
  0xfc   :  { %v415_v33 = vmul.f32 10.0, %v413_v42  ;;  %v799_v0 = vadd.f32 %v795_v15, %v1558_v43  ;;  %v782_v27 = vsel %vm1502_vm7, 0.035555556, %v1747_v53  ;;  %v783_v49 = vsel %vm1513_vm12, 0.035555556, %v1749_v31 }
  0xfd   :  { %v424_v39 = vadd.f32 %v419_v20, %v414_v22  ;;  %v804_v14 = vadd.f32 %v800_v29, %v798_v60  ;;  %v811_v25 = vrot.slane %v782_v27, %v1070_v19  ;;  %v815_v28 = vrot.slane %v783_v49, %v1070_v19 }
  0xfe   :  { %v425_v24 = vadd.f32 %v423_v35, %v415_v33  ;;  %v805_v57 = vadd.f32 %v801_v13, %v799_v0 }
  0xff   :  { %434 = vst [vmem:[#allocation3] sm:$0xc0] %v424_v39  ;;  %v806_v43 = vmul.f32 10.0, %v804_v14 }
 0x100   :  { %435 = vst [vmem:[#allocation3 + $0x8] sm:$0xc0] %v425_v24  ;;  %v807_v36 = vmul.f32 10.0, %v805_v57 }
 0x101   :  { %v816_v37 = vadd.f32 %v811_v25, %v806_v43 }
 0x102   :  { %v817_v51 = vadd.f32 %v815_v28, %v807_v36 }
 0x103   :  { %826 = vst [vmem:[#allocation3 + $0x10] sm:$0xc0] %v816_v37 }
 0x104   :  { %827 = vst [vmem:[#allocation3 + $0x18] sm:$0xc0] %v817_v51 }
 0x106   :  { %v828_v59 = vld [vmem:[#allocation3] sm:$0xff] }
 0x107   :  { %v829_v47 = vld [vmem:[#allocation3 + $0x8] sm:$0xff]  ;;  %v832_v55 = vsub.f32 0.0, %v828_v59 }
 0x108   :  { %v833_v7 = vsub.f32 0.0, %v829_v47 }
 0x109   :  { %v836_v17 = vmul.f32 1.442695, %v832_v55 }
 0x10a   :  { %v830_v12 = vld [vmem:[#allocation3 + $0x10] sm:$0xff]  ;;  %v838_v56 = vmul.f32 1.442695, %v833_v7 }
 0x10b   :  { %v831_v48 = vld [vmem:[#allocation3 + $0x18] sm:$0xff]  ;;  %v834_v10 = vsub.f32 0.0, %v830_v12  ;;  %898 = vpow2.f32 %v836_v17 }
 0x10c   :  { %v835_v16 = vsub.f32 0.0, %v831_v48  ;;  %900 = vpow2.f32 %v838_v56 }
 0x10d   :  { %v840_v50 = vmul.f32 1.442695, %v834_v10 }
 0x10e   :  { %v842_v19 = vmul.f32 1.442695, %v835_v16 }
 0x10f   :  { %902 = vpow2.f32 %v840_v50 }
 0x110   :  { %904 = vpow2.f32 %v842_v19 }
 0x115   :  { %v899_v3 = vpop.eup %898 }
 0x116   :  { %v901_v11 = vpop.eup %900  ;;  %v848_v31 = vmul.f32 %v899_v3, %v844_v21 }
 0x117   :  { %v849_v32 = vmul.f32 %v901_v11, %v845_v61 }
 0x119   :  { %v903_v53 = vpop.eup %902 }
 0x11a   :  { %v905_v45 = vpop.eup %904  ;;  %v850_v5 = vmul.f32 %v903_v53, %v846_v63 }
 0x11b   :  { %v851_v23 = vmul.f32 %v905_v45, %v847_v2 }
 0x11c   :  { %v852_v54 = vadd.f32 %v850_v5, %v848_v31 }
 0x11d   :  { %v859_v46 = vadd.f32 %v851_v23, %v849_v32 }
 0x11e   :  { %v853_v40 = vrot.slane %v852_v54, 4 }
 0x11f   :  { %v860_v30 = vrot.slane %v859_v46, 4 }
 0x120   :  { %v854_v8 = vadd.f32 %v853_v40, %v852_v54 }
 0x121   :  { %v861_v9 = vadd.f32 %v860_v30, %v859_v46 }
 0x122   :  { %v855_v6 = vrot.slane %v854_v8, 2 }
 0x123   :  { %v862_v38 = vrot.slane %v861_v9, 2 }
 0x124   :  { %v856_v18 = vadd.f32 %v855_v6, %v854_v8 }
 0x125   :  { %v863_v4 = vadd.f32 %v862_v38, %v861_v9 }
 0x126   :  { %v857_v41 = vrot.slane %v856_v18, 1 }
 0x127   :  { %v864_v26 = vrot.slane %v863_v4, 1 }
 0x128   :  { %v858_v62 = vadd.f32 %v857_v41, %v856_v18 }
 0x129   :  { %v865_v34 = vadd.f32 %v864_v26, %v863_v4 }
 0x12b   :  { %v866_v52 = vadd.f32 %v865_v34, %v858_v62 }
 0x12d   :  { %867 = vadd.xlane.f32.xlu0 %v866_v52 }
 0x1ba   :  { %v868_v42 = vpop.xlane.xlu0 %867 }
 0x1bb   :  { %869 = vst [vmem:[#allocation7] sm:$0x1] %v868_v42 }
 0x1bc   :  { %941 = shalt.err (!%p938_p12)
}
 0x1bd   :  { %s942_s8 = scalar_lea.hbm %s1669_s2, 16 }
 0x1be   :  { %p943_p13 = scmp.ne.s32.totalorder %s1669_s2, %s942_s8  ;;  %p946_p0 = scmp.lt.u32.totalorder %s942_s8, %s1669_s2 }
 0x1c0   :  { %p948_p1 = pnand %p946_p0, %p943_p13 }
 0x1c2   :  { %951 = shalt.err (!%p948_p1)
}
 0x1c3   :  { %879 = dma.vmem_to_hbm [thread:$0]  %s877_s3, 16, %s1669_s2, [#allocation6]  }
 0x1c4   :  { %954 = dma.done.wait [#allocation6], 16  }
 0x1c5   :  { %955 = vsyncadd [#allocation6], 4294967280 }
 0x1c6   :  { %883 = vsyncpa [#allocation5], 1 }
 0x1c7   :  { %884 = vsyncpa [#allocation6], 1 }

</bundles_post_ra>
